<compile_context>
chip_gen: v5e
topology: v5e:2x2
jax: 0.10.0
libtpu: 0.0.40
codegen_flags: <defaults>
</compile_context>

<pallas_src>
import functools

import jax
import jax.numpy as jnp
from jax import lax
from jax.experimental import pallas as pl
from jax.experimental.pallas import tpu as pltpu

_LANE = 128
_SUBLANE = 8


def _round_up(x: int, m: int) -> int:
    return ((x + m - 1) // m) * m


def _pos_encod(max_len: int, d_model: int) -> jnp.ndarray:
    """Replicates PosEmbedding.pos_encod: pe[p, i]=sin(p/den), pe[p, i+1]=cos(p/den)."""
    pos = jnp.arange(max_len, dtype=jnp.float32)[:, None]          # (max_len, 1)
    i = jnp.arange(d_model, dtype=jnp.float32)[None, :]            # (1, d_model)
    i_even = jnp.floor(i / 2.0) * 2.0                               # den uses the even index
    den = jnp.power(10000.0, i_even / d_model)
    angle = pos / den                                               # (max_len, d_model)
    pe = jnp.where((jnp.arange(d_model) % 2) == 0, jnp.sin(angle), jnp.cos(angle))
    return pe.astype(jnp.float32)


def prepare_token_table(token_table: jnp.ndarray) -> jnp.ndarray:
    """Pad the (V, D) embedding table to (V, D_pad) ONCE, outside the hot path.

    For real vocabularies re-padding per call is a full V*D*4-byte HBM copy that
    dwarfs the kernel; store the table pre-padded instead.
    """
    V, D = token_table.shape
    D_pad = _round_up(D, _LANE)
    return jnp.pad(token_table.astype(jnp.float32), ((0, 0), (0, D_pad - D)))


def _pos_embedding_kernel(ids_ref, table_hbm, pos_ref, out_ref, emb_buf, sem):
    # ids_ref:   (B*T_pad,) int32 SMEM (scalar prefetch) -- clamped token ids
    # table_hbm: (V, D_pad) f32 HBM (pl.ANY)             -- gathered row-by-row via DMA
    # pos_ref:   (tT, D_pad) f32 VMEM                    -- positional rows of this seq tile
    # out_ref:   (tT, D_pad) f32 VMEM                    -- output tile (batch dim squeezed)
    # emb_buf:   (2, tT, D_pad) f32 VMEM scratch         -- double-buffered gather target
    # sem:       (2,) DMA semaphores                     -- one per buffer slot
    tT = out_ref.shape[0]
    b = pl.program_id(0)
    t = pl.program_id(1)
    t_tiles = pl.num_programs(1)
    n_tiles = pl.num_programs(0) * t_tiles
    flat = b * t_tiles + t          # sequential tile index (grid iterates row-major)
    slot = flat % 2

    def gather_tile(tile_idx, dst_slot):
        base_tok = tile_idx * tT

        def issue(j, carry):
            tok = ids_ref[base_tok + j]                   # scalar read from SMEM
            pltpu.make_async_copy(
                table_hbm.at[tok],                        # (D_pad,) row in HBM
                emb_buf.at[dst_slot, j],                  # (D_pad,) row in VMEM
                sem.at[dst_slot],
            ).start()
            return carry

        # Descriptor issue is serialized on the vector-misc slot; partial unroll
        # hides the SMEM scalar-load latency without bloating the code.
        lax.fori_loop(0, tT, issue, 0, unroll=8)

    # Prime the pipeline with this (first) tile's rows.
    @pl.when(flat == 0)
    def _():
        gather_tile(0, 0)

    # Prefetch the next tile's rows into the other slot so its gather DMAs
    # overlap with this tile's add + store.  Requires sequential grid iteration.
    @pl.when(flat + 1 < n_tiles)
    def _():
        gather_tile(flat + 1, 1 - slot)

    # Single wait covering all tT row-copies destined for our slot
    # (descriptor bytes = tT * D_pad * 4 = sum of the issued row copies).
    pltpu.make_async_copy(emb_buf.at[0], emb_buf.at[1], sem.at[slot]).wait()

    # Keep the add in f32 (v5e VPU has no bf16 ALU); lane-dense unmasked store.
    out_ref[...] = (emb_buf[slot] + pos_ref[...]).astype(out_ref.dtype)


@functools.partial(jax.jit, static_argnames=("tile_tokens",))
def pos_embedding(x_ids, token_table_padded, pos_table, *, tile_tokens=256):
    """x_ids: (B, T) int; token_table_padded: (V, D_pad) f32 (see prepare_token_table);
    pos_table: (max_len, D) f32.  Returns (B, T, D) f32."""
    B, T = x_ids.shape
    V, D_pad = token_table_padded.shape
    max_len, D = pos_table.shape
    assert T <= max_len, "sequence length exceeds max_len of the positional table"
    assert D_pad == _round_up(D, _LANE), "token table must be pre-padded to a lane multiple"

    # Seq-dim tile (multiple of 8 sublanes).  Live VMEM ~ 8*tT*D_pad*4 B; on v7x
    # (64 MiB physical) cap tile_tokens so this stays well under budget.
    tT = min(_round_up(tile_tokens, _SUBLANE), _round_up(T, _SUBLANE))
    T_pad = _round_up(T, tT)
    t_tiles = T_pad // tT
    n_tok = B * T_pad

    # Clamp ids (the DMA gather has no bounds check; nn.Embedding would raise)
    # and pad.  Ids live in SMEM via scalar prefetch -> keep B*T modest (<~64K).
    ids = jnp.clip(x_ids.astype(jnp.int32), 0, V - 1)
    ids = jnp.pad(ids, ((0, 0), (0, T_pad - T))).reshape(-1)

    # Positional table: tiny, pad to (T_pad, D_pad).  Rows beyond T are zeros and
    # correspond to padding tokens that get sliced off below.
    # TODO(synk): for small D (e.g. 32) pack 128//D tokens per 128-lane row
    # instead of padding each row to 128 (saves 75% of gather/add/store bytes).
    pe = jnp.pad(pos_table.astype(jnp.float32)[:T], ((0, T_pad - T), (0, D_pad - D)))

    cost = pl.CostEstimate(
        flops=n_tok * D_pad,                                           # the add
        transcendentals=0,
        bytes_accessed=(2 * n_tok * D_pad + T_pad * D_pad) * 4 + n_tok * 4,
    )

    vmem_need = 8 * tT * D_pad * 4          # gather scratch + double-buffered pos/out + slack
    vmem_limit = int(min(max(32 * 1024 * 1024, vmem_need), 64 * 1024 * 1024))

    out = pl.pallas_call(
        _pos_embedding_kernel,
        out_shape=jax.ShapeDtypeStruct((B, T_pad, D_pad), jnp.float32),
        grid_spec=pltpu.PrefetchScalarGridSpec(
            num_scalar_prefetch=1,                                     # ids -> SMEM
            grid=(B, t_tiles),
            in_specs=[
                # TODO(synk): when V*D_pad*4 fits the VMEM budget, keep the table
                # VMEM-resident (or coalesce duplicate/contiguous ids into
                # multi-row DMAs) to escape the per-row descriptor bottleneck.
                pl.BlockSpec(memory_space=pl.ANY),                     # table stays in HBM
                pl.BlockSpec((tT, D_pad), lambda b, t, ids_sm: (t, 0)),  # pos rows of this tile
            ],
            out_specs=pl.BlockSpec((None, tT, D_pad), lambda b, t, ids_sm: (b, t, 0)),
            scratch_shapes=[
                pltpu.VMEM((2, tT, D_pad), jnp.float32),               # double-buffered gather
                pltpu.SemaphoreType.DMA((2,)),                         # one sem per slot
            ],
        ),
        compiler_params=pltpu.CompilerParams(
            # The cross-step gather prefetch carries state -> steps must run in order.
            # TODO(synk): on v7x add an outer "parallel" axis with per-core
            # prefetch chains to use both TensorCores.
            dimension_semantics=("arbitrary", "arbitrary"),
            vmem_limit_bytes=vmem_limit,
        ),
        cost_estimate=cost,
    )(ids, token_table_padded, pe)

    return out[:, :T, :D]


if __name__ == "__main__":
    # Small shapes consistent with the module's forward pass.
    vocab_size = 64
    d_model = 32          # deliberately not a multiple of 128: exercises lane padding
    max_len = 16
    batch = 2
    seq = 16

    key = jax.random.PRNGKey(0)
    k_tok, k_emb = jax.random.split(key)

    # Deterministic parameter init (nn.Embedding default ~ N(0, 1)).
    token_table = jax.random.normal(k_emb, (vocab_size, d_model), dtype=jnp.float32)
    pos_table = _pos_encod(max_len, d_model)

    # Deterministic example input tokens.
    x = jax.random.randint(k_tok, (batch, seq), 0, vocab_size, dtype=jnp.int32)

    # Pad the embedding table ONCE (not per call).
    table_padded = prepare_token_table(token_table)

    # tile_tokens=8 -> grid (2, 2) = 4 tiles: exercises the cross-tile gather
    # prefetch chain, including the batch-boundary crossing.
    out = pos_embedding(x, table_padded, pos_table, tile_tokens=8)
    out = jax.block_until_ready(out)

    # Reference check in plain JAX (token gather + pos add).
    ref = token_table[x] + pos_table[None, :seq, :]
    assert out.shape == (batch, seq, d_model)
    assert jnp.allclose(out, ref, atol=1e-5), "mismatch vs reference"

    print("KERNEL_OK")
</pallas_src>

<mosaic_0001>
module attributes {stable_mosaic.version = 11 : i64} {
  func.func @_pos_embedding_kernel(%arg0: i32, %arg1: i32, %arg2: memref<32xi32, #tpu.memory_space<smem>>, %arg3: memref<64x128xf32, #tpu.memory_space<any>>, %arg4: memref<8x128xf32, #tpu.memory_space<vmem>>, %arg5: memref<1x8x128xf32, #tpu.memory_space<vmem>>, %arg6: memref<2x8x128xf32, #tpu.memory_space<vmem>>, %arg7: memref<2x!tpu.dma_semaphore, #tpu.memory_space<semaphore_mem>>) attributes {dimension_semantics = [#tpu.dimension_semantics<arbitrary>, #tpu.dimension_semantics<arbitrary>], iteration_bounds = array<i64: 2, 2>, scalar_prefetch = 1 : i64, scratch_operands = 2 : i64, tpu.core_type = #tpu.core_type<tc>, window_params = [{}, {transform_indices = @transform_1, window_bounds = array<i64: 8, 128>}, {transform_indices = @transform_2, window_bounds = array<i64: 1, 8, 128>}]} {
    %c2_i32 = arith.constant 2 : i32
    %0 = arith.muli %arg0, %c2_i32 : i32
    %1 = arith.addi %0, %arg1 : i32
    %c2_i32_0 = arith.constant 2 : i32
    %c0_i32 = arith.constant 0 : i32
    %2 = arith.cmpi eq, %c2_i32_0, %c0_i32 : i32
    %c1_i32 = arith.constant 1 : i32
    %3 = arith.select %2, %c1_i32, %c2_i32_0 : i32
    %4 = arith.remsi %1, %3 : i32
    %c0_i32_1 = arith.constant 0 : i32
    %5 = arith.cmpi ne, %4, %c0_i32_1 : i32
    %c0_i32_2 = arith.constant 0 : i32
    %6 = arith.cmpi slt, %4, %c0_i32_2 : i32
    %c0_i32_3 = arith.constant 0 : i32
    %7 = arith.cmpi slt, %3, %c0_i32_3 : i32
    %8 = arith.xori %6, %7 : i1
    %9 = arith.andi %8, %5 : i1
    %10 = arith.addi %4, %3 : i32
    %11 = arith.select %9, %10, %4 : i32
    %c0_i32_4 = arith.constant 0 : i32
    %12 = arith.cmpi eq, %1, %c0_i32_4 : i32
    %13 = arith.extui %12 : i1 to i32
    %c0_i32_5 = arith.constant 0 : i32
    %14 = arith.cmpi ne, %13, %c0_i32_5 : i32
    scf.if %14 {
      %c0_i32_20 = arith.constant 0 : i32
      %c0_i32_21 = arith.constant 0 : i32
      %33 = arith.addi %c0_i32_21, %c0_i32_20 : i32
      %34 = arith.index_cast %33 : i32 to index
      %35 = memref.load %arg2[%34] : memref<32xi32, #tpu.memory_space<smem>>
      %c0_i32_22 = arith.constant 0 : i32
      %c0_i32_23 = arith.constant 0 : i32
      %c0_i32_24 = arith.constant 0 : i32
      %36 = tpu.memref_slice %arg3[%35, %c0_i32_24] : memref<64x128xf32, #tpu.memory_space<any>> -> memref<1x128xf32, #tpu.memory_space<any>>
      %37 = tpu.memref_squeeze %36 : memref<1x128xf32, #tpu.memory_space<any>> -> memref<128xf32, #tpu.memory_space<any>>
      %c0_i32_25 = arith.constant 0 : i32
      %38 = tpu.memref_slice %arg6[%c0_i32_22, %c0_i32_20, %c0_i32_25] : memref<2x8x128xf32, #tpu.memory_space<vmem>> -> memref<1x1x128xf32, #tpu.memory_space<vmem>>
      %39 = tpu.memref_squeeze %38 : memref<1x1x128xf32, #tpu.memory_space<vmem>> -> memref<128xf32, #tpu.memory_space<vmem>>
      %40 = tpu.memref_slice %arg7[%c0_i32_23] : memref<2x!tpu.dma_semaphore, #tpu.memory_space<semaphore_mem>> -> memref<1x!tpu.dma_semaphore, #tpu.memory_space<semaphore_mem>>
      %41 = tpu.memref_squeeze %40 : memref<1x!tpu.dma_semaphore, #tpu.memory_space<semaphore_mem>> -> memref<!tpu.dma_semaphore, #tpu.memory_space<semaphore_mem>>
      tpu.enqueue_dma source(%37 : memref<128xf32, #tpu.memory_space<any>>) target(%39 : memref<128xf32, #tpu.memory_space<vmem>>) target_semaphore(%41 : memref<!tpu.dma_semaphore, #tpu.memory_space<semaphore_mem>>)
      %c1_i32_26 = arith.constant 1 : i32
      %c0_i32_27 = arith.constant 0 : i32
      %42 = arith.addi %c0_i32_27, %c1_i32_26 : i32
      %43 = arith.index_cast %42 : i32 to index
      %44 = memref.load %arg2[%43] : memref<32xi32, #tpu.memory_space<smem>>
      %c0_i32_28 = arith.constant 0 : i32
      %c0_i32_29 = arith.constant 0 : i32
      %c0_i32_30 = arith.constant 0 : i32
      %45 = tpu.memref_slice %arg3[%44, %c0_i32_30] : memref<64x128xf32, #tpu.memory_space<any>> -> memref<1x128xf32, #tpu.memory_space<any>>
      %46 = tpu.memref_squeeze %45 : memref<1x128xf32, #tpu.memory_space<any>> -> memref<128xf32, #tpu.memory_space<any>>
      %c0_i32_31 = arith.constant 0 : i32
      %47 = tpu.memref_slice %arg6[%c0_i32_28, %c1_i32_26, %c0_i32_31] : memref<2x8x128xf32, #tpu.memory_space<vmem>> -> memref<1x1x128xf32, #tpu.memory_space<vmem>>
      %48 = tpu.memref_squeeze %47 : memref<1x1x128xf32, #tpu.memory_space<vmem>> -> memref<128xf32, #tpu.memory_space<vmem>>
      %49 = tpu.memref_slice %arg7[%c0_i32_29] : memref<2x!tpu.dma_semaphore, #tpu.memory_space<semaphore_mem>> -> memref<1x!tpu.dma_semaphore, #tpu.memory_space<semaphore_mem>>
      %50 = tpu.memref_squeeze %49 : memref<1x!tpu.dma_semaphore, #tpu.memory_space<semaphore_mem>> -> memref<!tpu.dma_semaphore, #tpu.memory_space<semaphore_mem>>
      tpu.enqueue_dma source(%46 : memref<128xf32, #tpu.memory_space<any>>) target(%48 : memref<128xf32, #tpu.memory_space<vmem>>) target_semaphore(%50 : memref<!tpu.dma_semaphore, #tpu.memory_space<semaphore_mem>>)
      %c2_i32_32 = arith.constant 2 : i32
      %c0_i32_33 = arith.constant 0 : i32
      %51 = arith.addi %c0_i32_33, %c2_i32_32 : i32
      %52 = arith.index_cast %51 : i32 to index
      %53 = memref.load %arg2[%52] : memref<32xi32, #tpu.memory_space<smem>>
      %c0_i32_34 = arith.constant 0 : i32
      %c0_i32_35 = arith.constant 0 : i32
      %c0_i32_36 = arith.constant 0 : i32
      %54 = tpu.memref_slice %arg3[%53, %c0_i32_36] : memref<64x128xf32, #tpu.memory_space<any>> -> memref<1x128xf32, #tpu.memory_space<any>>
      %55 = tpu.memref_squeeze %54 : memref<1x128xf32, #tpu.memory_space<any>> -> memref<128xf32, #tpu.memory_space<any>>
      %c0_i32_37 = arith.constant 0 : i32
      %56 = tpu.memref_slice %arg6[%c0_i32_34, %c2_i32_32, %c0_i32_37] : memref<2x8x128xf32, #tpu.memory_space<vmem>> -> memref<1x1x128xf32, #tpu.memory_space<vmem>>
      %57 = tpu.memref_squeeze %56 : memref<1x1x128xf32, #tpu.memory_space<vmem>> -> memref<128xf32, #tpu.memory_space<vmem>>
      %58 = tpu.memref_slice %arg7[%c0_i32_35] : memref<2x!tpu.dma_semaphore, #tpu.memory_space<semaphore_mem>> -> memref<1x!tpu.dma_semaphore, #tpu.memory_space<semaphore_mem>>
      %59 = tpu.memref_squeeze %58 : memref<1x!tpu.dma_semaphore, #tpu.memory_space<semaphore_mem>> -> memref<!tpu.dma_semaphore, #tpu.memory_space<semaphore_mem>>
      tpu.enqueue_dma source(%55 : memref<128xf32, #tpu.memory_space<any>>) target(%57 : memref<128xf32, #tpu.memory_space<vmem>>) target_semaphore(%59 : memref<!tpu.dma_semaphore, #tpu.memory_space<semaphore_mem>>)
      %c3_i32 = arith.constant 3 : i32
      %c0_i32_38 = arith.constant 0 : i32
      %60 = arith.addi %c0_i32_38, %c3_i32 : i32
      %61 = arith.index_cast %60 : i32 to index
      %62 = memref.load %arg2[%61] : memref<32xi32, #tpu.memory_space<smem>>
      %c0_i32_39 = arith.constant 0 : i32
      %c0_i32_40 = arith.constant 0 : i32
      %c0_i32_41 = arith.constant 0 : i32
      %63 = tpu.memref_slice %arg3[%62, %c0_i32_41] : memref<64x128xf32, #tpu.memory_space<any>> -> memref<1x128xf32, #tpu.memory_space<any>>
      %64 = tpu.memref_squeeze %63 : memref<1x128xf32, #tpu.memory_space<any>> -> memref<128xf32, #tpu.memory_space<any>>
      %c0_i32_42 = arith.constant 0 : i32
      %65 = tpu.memref_slice %arg6[%c0_i32_39, %c3_i32, %c0_i32_42] : memref<2x8x128xf32, #tpu.memory_space<vmem>> -> memref<1x1x128xf32, #tpu.memory_space<vmem>>
      %66 = tpu.memref_squeeze %65 : memref<1x1x128xf32, #tpu.memory_space<vmem>> -> memref<128xf32, #tpu.memory_space<vmem>>
      %67 = tpu.memref_slice %arg7[%c0_i32_40] : memref<2x!tpu.dma_semaphore, #tpu.memory_space<semaphore_mem>> -> memref<1x!tpu.dma_semaphore, #tpu.memory_space<semaphore_mem>>
      %68 = tpu.memref_squeeze %67 : memref<1x!tpu.dma_semaphore, #tpu.memory_space<semaphore_mem>> -> memref<!tpu.dma_semaphore, #tpu.memory_space<semaphore_mem>>
      tpu.enqueue_dma source(%64 : memref<128xf32, #tpu.memory_space<any>>) target(%66 : memref<128xf32, #tpu.memory_space<vmem>>) target_semaphore(%68 : memref<!tpu.dma_semaphore, #tpu.memory_space<semaphore_mem>>)
      %c4_i32_43 = arith.constant 4 : i32
      %c0_i32_44 = arith.constant 0 : i32
      %69 = arith.addi %c0_i32_44, %c4_i32_43 : i32
      %70 = arith.index_cast %69 : i32 to index
      %71 = memref.load %arg2[%70] : memref<32xi32, #tpu.memory_space<smem>>
      %c0_i32_45 = arith.constant 0 : i32
      %c0_i32_46 = arith.constant 0 : i32
      %c0_i32_47 = arith.constant 0 : i32
      %72 = tpu.memref_slice %arg3[%71, %c0_i32_47] : memref<64x128xf32, #tpu.memory_space<any>> -> memref<1x128xf32, #tpu.memory_space<any>>
      %73 = tpu.memref_squeeze %72 : memref<1x128xf32, #tpu.memory_space<any>> -> memref<128xf32, #tpu.memory_space<any>>
      %c0_i32_48 = arith.constant 0 : i32
      %74 = tpu.memref_slice %arg6[%c0_i32_45, %c4_i32_43, %c0_i32_48] : memref<2x8x128xf32, #tpu.memory_space<vmem>> -> memref<1x1x128xf32, #tpu.memory_space<vmem>>
      %75 = tpu.memref_squeeze %74 : memref<1x1x128xf32, #tpu.memory_space<vmem>> -> memref<128xf32, #tpu.memory_space<vmem>>
      %76 = tpu.memref_slice %arg7[%c0_i32_46] : memref<2x!tpu.dma_semaphore, #tpu.memory_space<semaphore_mem>> -> memref<1x!tpu.dma_semaphore, #tpu.memory_space<semaphore_mem>>
      %77 = tpu.memref_squeeze %76 : memref<1x!tpu.dma_semaphore, #tpu.memory_space<semaphore_mem>> -> memref<!tpu.dma_semaphore, #tpu.memory_space<semaphore_mem>>
      tpu.enqueue_dma source(%73 : memref<128xf32, #tpu.memory_space<any>>) target(%75 : memref<128xf32, #tpu.memory_space<vmem>>) target_semaphore(%77 : memref<!tpu.dma_semaphore, #tpu.memory_space<semaphore_mem>>)
      %c5_i32 = arith.constant 5 : i32
      %c0_i32_49 = arith.constant 0 : i32
      %78 = arith.addi %c0_i32_49, %c5_i32 : i32
      %79 = arith.index_cast %78 : i32 to index
      %80 = memref.load %arg2[%79] : memref<32xi32, #tpu.memory_space<smem>>
      %c0_i32_50 = arith.constant 0 : i32
      %c0_i32_51 = arith.constant 0 : i32
      %c0_i32_52 = arith.constant 0 : i32
      %81 = tpu.memref_slice %arg3[%80, %c0_i32_52] : memref<64x128xf32, #tpu.memory_space<any>> -> memref<1x128xf32, #tpu.memory_space<any>>
      %82 = tpu.memref_squeeze %81 : memref<1x128xf32, #tpu.memory_space<any>> -> memref<128xf32, #tpu.memory_space<any>>
      %c0_i32_53 = arith.constant 0 : i32
      %83 = tpu.memref_slice %arg6[%c0_i32_50, %c5_i32, %c0_i32_53] : memref<2x8x128xf32, #tpu.memory_space<vmem>> -> memref<1x1x128xf32, #tpu.memory_space<vmem>>
      %84 = tpu.memref_squeeze %83 : memref<1x1x128xf32, #tpu.memory_space<vmem>> -> memref<128xf32, #tpu.memory_space<vmem>>
      %85 = tpu.memref_slice %arg7[%c0_i32_51] : memref<2x!tpu.dma_semaphore, #tpu.memory_space<semaphore_mem>> -> memref<1x!tpu.dma_semaphore, #tpu.memory_space<semaphore_mem>>
      %86 = tpu.memref_squeeze %85 : memref<1x!tpu.dma_semaphore, #tpu.memory_space<semaphore_mem>> -> memref<!tpu.dma_semaphore, #tpu.memory_space<semaphore_mem>>
      tpu.enqueue_dma source(%82 : memref<128xf32, #tpu.memory_space<any>>) target(%84 : memref<128xf32, #tpu.memory_space<vmem>>) target_semaphore(%86 : memref<!tpu.dma_semaphore, #tpu.memory_space<semaphore_mem>>)
      %c6_i32 = arith.constant 6 : i32
      %c0_i32_54 = arith.constant 0 : i32
      %87 = arith.addi %c0_i32_54, %c6_i32 : i32
      %88 = arith.index_cast %87 : i32 to index
      %89 = memref.load %arg2[%88] : memref<32xi32, #tpu.memory_space<smem>>
      %c0_i32_55 = arith.constant 0 : i32
      %c0_i32_56 = arith.constant 0 : i32
      %c0_i32_57 = arith.constant 0 : i32
      %90 = tpu.memref_slice %arg3[%89, %c0_i32_57] : memref<64x128xf32, #tpu.memory_space<any>> -> memref<1x128xf32, #tpu.memory_space<any>>
      %91 = tpu.memref_squeeze %90 : memref<1x128xf32, #tpu.memory_space<any>> -> memref<128xf32, #tpu.memory_space<any>>
      %c0_i32_58 = arith.constant 0 : i32
      %92 = tpu.memref_slice %arg6[%c0_i32_55, %c6_i32, %c0_i32_58] : memref<2x8x128xf32, #tpu.memory_space<vmem>> -> memref<1x1x128xf32, #tpu.memory_space<vmem>>
      %93 = tpu.memref_squeeze %92 : memref<1x1x128xf32, #tpu.memory_space<vmem>> -> memref<128xf32, #tpu.memory_space<vmem>>
      %94 = tpu.memref_slice %arg7[%c0_i32_56] : memref<2x!tpu.dma_semaphore, #tpu.memory_space<semaphore_mem>> -> memref<1x!tpu.dma_semaphore, #tpu.memory_space<semaphore_mem>>
      %95 = tpu.memref_squeeze %94 : memref<1x!tpu.dma_semaphore, #tpu.memory_space<semaphore_mem>> -> memref<!tpu.dma_semaphore, #tpu.memory_space<semaphore_mem>>
      tpu.enqueue_dma source(%91 : memref<128xf32, #tpu.memory_space<any>>) target(%93 : memref<128xf32, #tpu.memory_space<vmem>>) target_semaphore(%95 : memref<!tpu.dma_semaphore, #tpu.memory_space<semaphore_mem>>)
      %c7_i32 = arith.constant 7 : i32
      %c0_i32_59 = arith.constant 0 : i32
      %96 = arith.addi %c0_i32_59, %c7_i32 : i32
      %97 = arith.index_cast %96 : i32 to index
      %98 = memref.load %arg2[%97] : memref<32xi32, #tpu.memory_space<smem>>
      %c0_i32_60 = arith.constant 0 : i32
      %c0_i32_61 = arith.constant 0 : i32
      %c0_i32_62 = arith.constant 0 : i32
      %99 = tpu.memref_slice %arg3[%98, %c0_i32_62] : memref<64x128xf32, #tpu.memory_space<any>> -> memref<1x128xf32, #tpu.memory_space<any>>
      %100 = tpu.memref_squeeze %99 : memref<1x128xf32, #tpu.memory_space<any>> -> memref<128xf32, #tpu.memory_space<any>>
      %c0_i32_63 = arith.constant 0 : i32
      %101 = tpu.memref_slice %arg6[%c0_i32_60, %c7_i32, %c0_i32_63] : memref<2x8x128xf32, #tpu.memory_space<vmem>> -> memref<1x1x128xf32, #tpu.memory_space<vmem>>
      %102 = tpu.memref_squeeze %101 : memref<1x1x128xf32, #tpu.memory_space<vmem>> -> memref<128xf32, #tpu.memory_space<vmem>>
      %103 = tpu.memref_slice %arg7[%c0_i32_61] : memref<2x!tpu.dma_semaphore, #tpu.memory_space<semaphore_mem>> -> memref<1x!tpu.dma_semaphore, #tpu.memory_space<semaphore_mem>>
      %104 = tpu.memref_squeeze %103 : memref<1x!tpu.dma_semaphore, #tpu.memory_space<semaphore_mem>> -> memref<!tpu.dma_semaphore, #tpu.memory_space<semaphore_mem>>
      tpu.enqueue_dma source(%100 : memref<128xf32, #tpu.memory_space<any>>) target(%102 : memref<128xf32, #tpu.memory_space<vmem>>) target_semaphore(%104 : memref<!tpu.dma_semaphore, #tpu.memory_space<semaphore_mem>>)
      %c8_i32 = arith.constant 8 : i32
    } else {
    }
    %c1_i32_6 = arith.constant 1 : i32
    %15 = arith.addi %1, %c1_i32_6 : i32
    %c4_i32 = arith.constant 4 : i32
    %16 = arith.cmpi slt, %15, %c4_i32 : i32
    %17 = arith.extui %16 : i1 to i32
    %c0_i32_7 = arith.constant 0 : i32
    %18 = arith.cmpi ne, %17, %c0_i32_7 : i32
    scf.if %18 {
      %c1_i32_20 = arith.constant 1 : i32
      %33 = arith.addi %1, %c1_i32_20 : i32
      %c1_i32_21 = arith.constant 1 : i32
      %34 = arith.subi %c1_i32_21, %11 : i32
      %c8_i32 = arith.constant 8 : i32
      %35 = arith.muli %33, %c8_i32 : i32
      %c0_i32_22 = arith.constant 0 : i32
      %36 = arith.addi %35, %c0_i32_22 : i32
      %37 = arith.index_cast %36 : i32 to index
      %38 = memref.load %arg2[%37] : memref<32xi32, #tpu.memory_space<smem>>
      %c0_i32_23 = arith.constant 0 : i32
      %39 = tpu.memref_slice %arg3[%38, %c0_i32_23] : memref<64x128xf32, #tpu.memory_space<any>> -> memref<1x128xf32, #tpu.memory_space<any>>
      %40 = tpu.memref_squeeze %39 : memref<1x128xf32, #tpu.memory_space<any>> -> memref<128xf32, #tpu.memory_space<any>>
      %c0_i32_24 = arith.constant 0 : i32
      %41 = tpu.memref_slice %arg6[%34, %c0_i32_22, %c0_i32_24] : memref<2x8x128xf32, #tpu.memory_space<vmem>> -> memref<1x1x128xf32, #tpu.memory_space<vmem>>
      %42 = tpu.memref_squeeze %41 : memref<1x1x128xf32, #tpu.memory_space<vmem>> -> memref<128xf32, #tpu.memory_space<vmem>>
      %43 = tpu.memref_slice %arg7[%34] : memref<2x!tpu.dma_semaphore, #tpu.memory_space<semaphore_mem>> -> memref<1x!tpu.dma_semaphore, #tpu.memory_space<semaphore_mem>>
      %44 = tpu.memref_squeeze %43 : memref<1x!tpu.dma_semaphore, #tpu.memory_space<semaphore_mem>> -> memref<!tpu.dma_semaphore, #tpu.memory_space<semaphore_mem>>
      tpu.enqueue_dma source(%40 : memref<128xf32, #tpu.memory_space<any>>) target(%42 : memref<128xf32, #tpu.memory_space<vmem>>) target_semaphore(%44 : memref<!tpu.dma_semaphore, #tpu.memory_space<semaphore_mem>>)
      %c1_i32_25 = arith.constant 1 : i32
      %45 = arith.addi %35, %c1_i32_25 : i32
      %46 = arith.index_cast %45 : i32 to index
      %47 = memref.load %arg2[%46] : memref<32xi32, #tpu.memory_space<smem>>
      %c0_i32_26 = arith.constant 0 : i32
      %48 = tpu.memref_slice %arg3[%47, %c0_i32_26] : memref<64x128xf32, #tpu.memory_space<any>> -> memref<1x128xf32, #tpu.memory_space<any>>
      %49 = tpu.memref_squeeze %48 : memref<1x128xf32, #tpu.memory_space<any>> -> memref<128xf32, #tpu.memory_space<any>>
      %c0_i32_27 = arith.constant 0 : i32
      %50 = tpu.memref_slice %arg6[%34, %c1_i32_25, %c0_i32_27] : memref<2x8x128xf32, #tpu.memory_space<vmem>> -> memref<1x1x128xf32, #tpu.memory_space<vmem>>
      %51 = tpu.memref_squeeze %50 : memref<1x1x128xf32, #tpu.memory_space<vmem>> -> memref<128xf32, #tpu.memory_space<vmem>>
      %52 = tpu.memref_slice %arg7[%34] : memref<2x!tpu.dma_semaphore, #tpu.memory_space<semaphore_mem>> -> memref<1x!tpu.dma_semaphore, #tpu.memory_space<semaphore_mem>>
      %53 = tpu.memref_squeeze %52 : memref<1x!tpu.dma_semaphore, #tpu.memory_space<semaphore_mem>> -> memref<!tpu.dma_semaphore, #tpu.memory_space<semaphore_mem>>
      tpu.enqueue_dma source(%49 : memref<128xf32, #tpu.memory_space<any>>) target(%51 : memref<128xf32, #tpu.memory_space<vmem>>) target_semaphore(%53 : memref<!tpu.dma_semaphore, #tpu.memory_space<semaphore_mem>>)
      %c2_i32_28 = arith.constant 2 : i32
      %54 = arith.addi %35, %c2_i32_28 : i32
      %55 = arith.index_cast %54 : i32 to index
      %56 = memref.load %arg2[%55] : memref<32xi32, #tpu.memory_space<smem>>
      %c0_i32_29 = arith.constant 0 : i32
      %57 = tpu.memref_slice %arg3[%56, %c0_i32_29] : memref<64x128xf32, #tpu.memory_space<any>> -> memref<1x128xf32, #tpu.memory_space<any>>
      %58 = tpu.memref_squeeze %57 : memref<1x128xf32, #tpu.memory_space<any>> -> memref<128xf32, #tpu.memory_space<any>>
      %c0_i32_30 = arith.constant 0 : i32
      %59 = tpu.memref_slice %arg6[%34, %c2_i32_28, %c0_i32_30] : memref<2x8x128xf32, #tpu.memory_space<vmem>> -> memref<1x1x128xf32, #tpu.memory_space<vmem>>
      %60 = tpu.memref_squeeze %59 : memref<1x1x128xf32, #tpu.memory_space<vmem>> -> memref<128xf32, #tpu.memory_space<vmem>>
      %61 = tpu.memref_slice %arg7[%34] : memref<2x!tpu.dma_semaphore, #tpu.memory_space<semaphore_mem>> -> memref<1x!tpu.dma_semaphore, #tpu.memory_space<semaphore_mem>>
      %62 = tpu.memref_squeeze %61 : memref<1x!tpu.dma_semaphore, #tpu.memory_space<semaphore_mem>> -> memref<!tpu.dma_semaphore, #tpu.memory_space<semaphore_mem>>
      tpu.enqueue_dma source(%58 : memref<128xf32, #tpu.memory_space<any>>) target(%60 : memref<128xf32, #tpu.memory_space<vmem>>) target_semaphore(%62 : memref<!tpu.dma_semaphore, #tpu.memory_space<semaphore_mem>>)
      %c3_i32 = arith.constant 3 : i32
      %63 = arith.addi %35, %c3_i32 : i32
      %64 = arith.index_cast %63 : i32 to index
      %65 = memref.load %arg2[%64] : memref<32xi32, #tpu.memory_space<smem>>
      %c0_i32_31 = arith.constant 0 : i32
      %66 = tpu.memref_slice %arg3[%65, %c0_i32_31] : memref<64x128xf32, #tpu.memory_space<any>> -> memref<1x128xf32, #tpu.memory_space<any>>
      %67 = tpu.memref_squeeze %66 : memref<1x128xf32, #tpu.memory_space<any>> -> memref<128xf32, #tpu.memory_space<any>>
      %c0_i32_32 = arith.constant 0 : i32
      %68 = tpu.memref_slice %arg6[%34, %c3_i32, %c0_i32_32] : memref<2x8x128xf32, #tpu.memory_space<vmem>> -> memref<1x1x128xf32, #tpu.memory_space<vmem>>
      %69 = tpu.memref_squeeze %68 : memref<1x1x128xf32, #tpu.memory_space<vmem>> -> memref<128xf32, #tpu.memory_space<vmem>>
      %70 = tpu.memref_slice %arg7[%34] : memref<2x!tpu.dma_semaphore, #tpu.memory_space<semaphore_mem>> -> memref<1x!tpu.dma_semaphore, #tpu.memory_space<semaphore_mem>>
      %71 = tpu.memref_squeeze %70 : memref<1x!tpu.dma_semaphore, #tpu.memory_space<semaphore_mem>> -> memref<!tpu.dma_semaphore, #tpu.memory_space<semaphore_mem>>
      tpu.enqueue_dma source(%67 : memref<128xf32, #tpu.memory_space<any>>) target(%69 : memref<128xf32, #tpu.memory_space<vmem>>) target_semaphore(%71 : memref<!tpu.dma_semaphore, #tpu.memory_space<semaphore_mem>>)
      %c4_i32_33 = arith.constant 4 : i32
      %72 = arith.addi %35, %c4_i32_33 : i32
      %73 = arith.index_cast %72 : i32 to index
      %74 = memref.load %arg2[%73] : memref<32xi32, #tpu.memory_space<smem>>
      %c0_i32_34 = arith.constant 0 : i32
      %75 = tpu.memref_slice %arg3[%74, %c0_i32_34] : memref<64x128xf32, #tpu.memory_space<any>> -> memref<1x128xf32, #tpu.memory_space<any>>
      %76 = tpu.memref_squeeze %75 : memref<1x128xf32, #tpu.memory_space<any>> -> memref<128xf32, #tpu.memory_space<any>>
      %c0_i32_35 = arith.constant 0 : i32
      %77 = tpu.memref_slice %arg6[%34, %c4_i32_33, %c0_i32_35] : memref<2x8x128xf32, #tpu.memory_space<vmem>> -> memref<1x1x128xf32, #tpu.memory_space<vmem>>
      %78 = tpu.memref_squeeze %77 : memref<1x1x128xf32, #tpu.memory_space<vmem>> -> memref<128xf32, #tpu.memory_space<vmem>>
      %79 = tpu.memref_slice %arg7[%34] : memref<2x!tpu.dma_semaphore, #tpu.memory_space<semaphore_mem>> -> memref<1x!tpu.dma_semaphore, #tpu.memory_space<semaphore_mem>>
      %80 = tpu.memref_squeeze %79 : memref<1x!tpu.dma_semaphore, #tpu.memory_space<semaphore_mem>> -> memref<!tpu.dma_semaphore, #tpu.memory_space<semaphore_mem>>
      tpu.enqueue_dma source(%76 : memref<128xf32, #tpu.memory_space<any>>) target(%78 : memref<128xf32, #tpu.memory_space<vmem>>) target_semaphore(%80 : memref<!tpu.dma_semaphore, #tpu.memory_space<semaphore_mem>>)
      %c5_i32 = arith.constant 5 : i32
      %81 = arith.addi %35, %c5_i32 : i32
      %82 = arith.index_cast %81 : i32 to index
      %83 = memref.load %arg2[%82] : memref<32xi32, #tpu.memory_space<smem>>
      %c0_i32_36 = arith.constant 0 : i32
      %84 = tpu.memref_slice %arg3[%83, %c0_i32_36] : memref<64x128xf32, #tpu.memory_space<any>> -> memref<1x128xf32, #tpu.memory_space<any>>
      %85 = tpu.memref_squeeze %84 : memref<1x128xf32, #tpu.memory_space<any>> -> memref<128xf32, #tpu.memory_space<any>>
      %c0_i32_37 = arith.constant 0 : i32
      %86 = tpu.memref_slice %arg6[%34, %c5_i32, %c0_i32_37] : memref<2x8x128xf32, #tpu.memory_space<vmem>> -> memref<1x1x128xf32, #tpu.memory_space<vmem>>
      %87 = tpu.memref_squeeze %86 : memref<1x1x128xf32, #tpu.memory_space<vmem>> -> memref<128xf32, #tpu.memory_space<vmem>>
      %88 = tpu.memref_slice %arg7[%34] : memref<2x!tpu.dma_semaphore, #tpu.memory_space<semaphore_mem>> -> memref<1x!tpu.dma_semaphore, #tpu.memory_space<semaphore_mem>>
      %89 = tpu.memref_squeeze %88 : memref<1x!tpu.dma_semaphore, #tpu.memory_space<semaphore_mem>> -> memref<!tpu.dma_semaphore, #tpu.memory_space<semaphore_mem>>
      tpu.enqueue_dma source(%85 : memref<128xf32, #tpu.memory_space<any>>) target(%87 : memref<128xf32, #tpu.memory_space<vmem>>) target_semaphore(%89 : memref<!tpu.dma_semaphore, #tpu.memory_space<semaphore_mem>>)
      %c6_i32 = arith.constant 6 : i32
      %90 = arith.addi %35, %c6_i32 : i32
      %91 = arith.index_cast %90 : i32 to index
      %92 = memref.load %arg2[%91] : memref<32xi32, #tpu.memory_space<smem>>
      %c0_i32_38 = arith.constant 0 : i32
      %93 = tpu.memref_slice %arg3[%92, %c0_i32_38] : memref<64x128xf32, #tpu.memory_space<any>> -> memref<1x128xf32, #tpu.memory_space<any>>
      %94 = tpu.memref_squeeze %93 : memref<1x128xf32, #tpu.memory_space<any>> -> memref<128xf32, #tpu.memory_space<any>>
      %c0_i32_39 = arith.constant 0 : i32
      %95 = tpu.memref_slice %arg6[%34, %c6_i32, %c0_i32_39] : memref<2x8x128xf32, #tpu.memory_space<vmem>> -> memref<1x1x128xf32, #tpu.memory_space<vmem>>
      %96 = tpu.memref_squeeze %95 : memref<1x1x128xf32, #tpu.memory_space<vmem>> -> memref<128xf32, #tpu.memory_space<vmem>>
      %97 = tpu.memref_slice %arg7[%34] : memref<2x!tpu.dma_semaphore, #tpu.memory_space<semaphore_mem>> -> memref<1x!tpu.dma_semaphore, #tpu.memory_space<semaphore_mem>>
      %98 = tpu.memref_squeeze %97 : memref<1x!tpu.dma_semaphore, #tpu.memory_space<semaphore_mem>> -> memref<!tpu.dma_semaphore, #tpu.memory_space<semaphore_mem>>
      tpu.enqueue_dma source(%94 : memref<128xf32, #tpu.memory_space<any>>) target(%96 : memref<128xf32, #tpu.memory_space<vmem>>) target_semaphore(%98 : memref<!tpu.dma_semaphore, #tpu.memory_space<semaphore_mem>>)
      %c7_i32 = arith.constant 7 : i32
      %99 = arith.addi %35, %c7_i32 : i32
      %100 = arith.index_cast %99 : i32 to index
      %101 = memref.load %arg2[%100] : memref<32xi32, #tpu.memory_space<smem>>
      %c0_i32_40 = arith.constant 0 : i32
      %102 = tpu.memref_slice %arg3[%101, %c0_i32_40] : memref<64x128xf32, #tpu.memory_space<any>> -> memref<1x128xf32, #tpu.memory_space<any>>
      %103 = tpu.memref_squeeze %102 : memref<1x128xf32, #tpu.memory_space<any>> -> memref<128xf32, #tpu.memory_space<any>>
      %c0_i32_41 = arith.constant 0 : i32
      %104 = tpu.memref_slice %arg6[%34, %c7_i32, %c0_i32_41] : memref<2x8x128xf32, #tpu.memory_space<vmem>> -> memref<1x1x128xf32, #tpu.memory_space<vmem>>
      %105 = tpu.memref_squeeze %104 : memref<1x1x128xf32, #tpu.memory_space<vmem>> -> memref<128xf32, #tpu.memory_space<vmem>>
      %106 = tpu.memref_slice %arg7[%34] : memref<2x!tpu.dma_semaphore, #tpu.memory_space<semaphore_mem>> -> memref<1x!tpu.dma_semaphore, #tpu.memory_space<semaphore_mem>>
      %107 = tpu.memref_squeeze %106 : memref<1x!tpu.dma_semaphore, #tpu.memory_space<semaphore_mem>> -> memref<!tpu.dma_semaphore, #tpu.memory_space<semaphore_mem>>
      tpu.enqueue_dma source(%103 : memref<128xf32, #tpu.memory_space<any>>) target(%105 : memref<128xf32, #tpu.memory_space<vmem>>) target_semaphore(%107 : memref<!tpu.dma_semaphore, #tpu.memory_space<semaphore_mem>>)
      %c8_i32_42 = arith.constant 8 : i32
    } else {
    }
    %c0_i32_8 = arith.constant 0 : i32
    %c1_i32_9 = arith.constant 1 : i32
    %c0_i32_10 = arith.constant 0 : i32
    %c0_i32_11 = arith.constant 0 : i32
    %19 = tpu.memref_slice %arg6[%c0_i32_8, %c0_i32_10, %c0_i32_11] : memref<2x8x128xf32, #tpu.memory_space<vmem>> -> memref<1x8x128xf32, #tpu.memory_space<vmem>>
    %20 = tpu.memref_squeeze %19 : memref<1x8x128xf32, #tpu.memory_space<vmem>> -> memref<8x128xf32, #tpu.memory_space<vmem>>
    %c0_i32_12 = arith.constant 0 : i32
    %c0_i32_13 = arith.constant 0 : i32
    %21 = tpu.memref_slice %arg6[%c1_i32_9, %c0_i32_12, %c0_i32_13] : memref<2x8x128xf32, #tpu.memory_space<vmem>> -> memref<1x8x128xf32, #tpu.memory_space<vmem>>
    %22 = tpu.memref_squeeze %21 : memref<1x8x128xf32, #tpu.memory_space<vmem>> -> memref<8x128xf32, #tpu.memory_space<vmem>>
    %23 = tpu.memref_slice %arg7[%11] : memref<2x!tpu.dma_semaphore, #tpu.memory_space<semaphore_mem>> -> memref<1x!tpu.dma_semaphore, #tpu.memory_space<semaphore_mem>>
    %24 = tpu.memref_squeeze %23 : memref<1x!tpu.dma_semaphore, #tpu.memory_space<semaphore_mem>> -> memref<!tpu.dma_semaphore, #tpu.memory_space<semaphore_mem>>
    tpu.wait_dma2 semaphore(%24 : memref<!tpu.dma_semaphore, #tpu.memory_space<semaphore_mem>>) src(%20 : memref<8x128xf32, #tpu.memory_space<vmem>>) dst(%22 : memref<8x128xf32, #tpu.memory_space<vmem>>)
    %25 = arith.index_cast %11 : i32 to index
    %c0 = arith.constant 0 : index
    %c0_14 = arith.constant 0 : index
    %26 = vector.load %arg6[%25, %c0, %c0_14] : memref<2x8x128xf32, #tpu.memory_space<vmem>>, vector<1x8x128xf32>
    %27 = vector.shape_cast %26 : vector<1x8x128xf32> to vector<8x128xf32>
    %c0_15 = arith.constant 0 : index
    %c0_16 = arith.constant 0 : index
    %28 = vector.load %arg4[%c0_15, %c0_16] : memref<8x128xf32, #tpu.memory_space<vmem>>, vector<8x128xf32>
    %29 = arith.addf %27, %28 : vector<8x128xf32>
    %c0_17 = arith.constant 0 : index
    %c0_18 = arith.constant 0 : index
    %c0_19 = arith.constant 0 : index
    %30 = vector.load %arg5[%c0_17, %c0_18, %c0_19] : memref<1x8x128xf32, #tpu.memory_space<vmem>>, vector<1x8x128xf32>
    %31 = vector.shape_cast %30 : vector<1x8x128xf32> to vector<8x128xf32>
    %32 = vector.shape_cast %29 : vector<8x128xf32> to vector<1x8x128xf32>
    tpu.vector_store %arg5[%c0_17, %c0_18, %c0_19], %32 {strides = array<i32>} : memref<1x8x128xf32, #tpu.memory_space<vmem>>, vector<1x8x128xf32>,
    return
  }
  func.func @transform_1(%arg0: i32, %arg1: i32, %arg2: memref<32xi32, #tpu.memory_space<smem>>) -> (i32, i32) {
    %c0_i32 = arith.constant 0 : i32
    %c0_i32_0 = arith.constant 0 : i32
    return %arg1, %c0_i32 : i32, i32
  }
  func.func @transform_2(%arg0: i32, %arg1: i32, %arg2: memref<32xi32, #tpu.memory_space<smem>>) -> (i32, i32, i32) {
    %c0_i32 = arith.constant 0 : i32
    %c0_i32_0 = arith.constant 0 : i32
    return %arg0, %arg1, %c0_i32 : i32, i32, i32
  }
}

</mosaic_0001>

<bundles_post_ra>
// kernel: pos_embedding.1
= control target key start
LH: loop header
LB: loop body
LE: loop exit
PB: predicated region body
PF: predicated region fallthrough
CT: control target
= control target key end

     0   :  { %s1303_s15 = smov [#allocation5]   ;;  %s1844_s0 = inlined_call_operand.vmem [shape: s32[32], index: 0, kind: input, shape index: {}]   ;;  %s1845_s1 = inlined_call_operand.hbm [shape: f32[64,128], index: 1, kind: input, shape index: {}]   ;;  %s1846_s2 = inlined_call_operand.vmem [shape: f32[16,128], index: 2, kind: input, shape index: {}]   ;;  %s1847_s3 = inlined_call_operand.hbm [shape: f32[2,16,128], index: 3, kind: output, shape index: {}]  }
   0x1   :  { %1864 = sst [smem:[#allocation63_spill]] %s1846_s2  ;;  %s9_s14 = sshll.u32 %s1844_s0, 4  ;;  %s10_s14 = int_to_ptr.vmem [resolvable:$true] %s9_s14 }
   0x2   :  { %12 = dma.vmem_to_smem %s10_s14, 16, %s1303_s15, [#allocation4] }
   0x3   :  { %1263 = dma.done.wait [#allocation4], 16 }
   0x4   :  { %1264 = vsyncadd [#allocation4], 4294967280 }
   0x5   :  { %15 = sfence }
   0x6   :  { %16 = vsyncpa [#allocation7], 0 }
   0x7   :  { %18 = vsyncpa [#allocation7 + $0x1], 0  ;;  %s1335_s16 = smov 0   ;;  %s1337_s17 = smov 0  }
   0x8   :  { %s1339_s18 = smov 0   ;;  %s1341_s19 = smov 0  }
   0x9   :  { %s1343_s20 = smov 0   ;;  %s1345_s21 = smov 0  }
   0xa   :  { %s1347_s0 = smov 0   ;;  %s1349_s22 = smov 0  }
   0xb LB: > { %1865 = sst [smem:[#allocation53_spill]] %s1273_s16  ;;  %s588_s23 = sadd.s32 4294967295, %s1301_s22   ;;  %s1301_s22 = sphi %s1349_s22, %s24_s22   ;;  %s1297_s0 = sphi %s1347_s0, %s1900_s0   ;;  %s1293_s21 = sphi %s1345_s21, %s1899_s21   ;;  %s1289_s20 = sphi %s1343_s20, %s1898_s20   ;;  %s1285_s19 = sphi %s1341_s19, %s1897_s19   ;;  %s1281_s18 = sphi %s1339_s18, %s1896_s18   ;;  %s1277_s17 = sphi %s1337_s17, %s1902_s17   ;;  %s1273_s16 = sphi %s1335_s16, %s1901_s16  }
   0xc   : > { %1866 = sst [smem:[#allocation54_spill]] %s1281_s18  ;;  %s589_s24 = sadd.s32 4294967294, %s1301_s22  }
   0xd   : > { %1867 = sst [smem:[#allocation55_spill]] %s1293_s21  ;;  %s33_s25 = sadd.s32 1, %s1293_s21 }
   0xe   : > { %1868 = sst [smem:[#allocation56_spill]] %s1297_s0  ;;  %p34_p0 = scmp.ge.s32.totalorder %s33_s25, 2 }
   0xf   : > { %1869 = sst [smem:[#allocation57_spill]] %s1301_s22  ;;  %s36_s26 = sadd.s32 1, %s1297_s0 }
  0x10   : > { %p81_p1 = scmp.ne.s32.totalorder %s1281_s18, %s1277_s17  ;;  %p82_p2 = scmp.eq.s32.totalorder %s588_s23, 3 }
  0x11   : > { %s1904_s25 = smov (%p34_p0, %s33_s25), 0  ;;  %s1906_s26 = smov (!%p34_p0, %s36_s26), %s1297_s0 }
  0x12   : > { %1870 = sst [smem:[#allocation58_spill]] %s1904_s25  ;;  %s67_s27 = ssub.s32 %s1293_s21, %s1904_s25 }
  0x13   : > { %p1386_p3 = por %p82_p2, %p81_p1  ;;  %p38_p4 = scmp.ge.s32.totalorder %s1906_s26, 2 }
  0x14   : > { %p87_p5 = scmp.ne.s32.totalorder %s1277_s17, %s1273_s16  ;;  %p88_p6 = scmp.eq.s32.totalorder %s589_s24, 3 }
  0x15   : > { %p592_p7 = scmp.ge.s32.totalorder %s1301_s22, 1  ;;  %s1908_s26 = smov (%p38_p4, %s1906_s26), 0 }
  0x16   : > { %1872 = sst [smem:[#allocation59_spill]] %s1908_s26  ;;  %p1395_p8 = por %p88_p6, %p87_p5 }
  0x17   : > { %p113_p9 = scmp.lt.s32.totalorder %s1301_s22, 5  ;;  %s66_s30 = ssub.s32 %s1297_s0, %s1908_s26 }
  0x18   : > { %s1873_s29 = scalar_select %p1395_p8, 1, 0 }
  0x19   : > { %s71_s4 = sadd.s32 1, %s1281_s18  ;;  %s68_s5 = sor.u32 %s67_s27, %s66_s30 }
  0x1a   : > { %1874 = sst [smem:[#allocation60_spill]] %s1873_s29  ;;  %p114_p10 = pnand %p592_p7, %p113_p9 }
  0x1b   : > { %p69_p11 = scmp.eq.s32.totalorder %s68_s5, 0 }
  0x1c   : > { %117 = sbr.rel (%p114_p10) target bundleno = 418 (0x1a2), region = 24 }
  0x1d   : > { %s1404_s6 = scalar_select %p69_p11, %s1281_s18, %s71_s4  }
  0x1f   : > { %1875 = sst [smem:[#allocation61_spill]] %s1404_s6 }
  0x21   : > { %s1848_s7 = sand.u32 1, %s1277_s17   ;;  %p132_p12 = scmp.lt.s32.totalorder %s1285_s19, 1 }
  0x22   : > { %s1410_s8 = sshll.u32 %s1848_s7, 3  ;;  %s595_s9 = sshll.u32 %s1289_s20, 1 }
  0x23   : > { %s1414_s10 = sadd.s32 %s1285_s19, %s595_s9  ;;  %s1910_s19 = smov (!%p132_p12, %s1285_s19), 1 }
  0x24   : > { %p667_p13 = scmp.eq.s32.totalorder %s1414_s10, 0  ;;  %s594_s11 = sshll.u32 %s1910_s19, 3 }
  0x25   : > { %s154_s12 = sld [smem:[#allocation5]]  ;;  %s1849_s23 = smov [#allocation2]  }
  0x26   : > { %s1876_s2 = sld [smem:[#allocation63_spill]]  ;;  %s165_s24 = sshll.u32 %s1849_s23, 4  ;;  %s166_s24 = int_to_ptr.vmem [resolvable:$true] %s165_s24 }
  0x27   : > { %s281_s27 = sadd.s32 1, %s1414_s10  ;;  %s600_s30 = sld [smem:[#allocation5 + $0x1]] }
  0x28   : > { %p1425_p0 = scmp.lt.s32.totalorder %s281_s27, 4  ;;  %s601_s4 = sld [smem:[#allocation5 + $0x2]] }
  0x29   : > { %s1305_s7 = smov [#allocation2 + $0x1]   ;;  %s1440_s26 = scalar_lea.hbm %s1845_s1, 64 }
  0x2a   : > { %s1432_s13 = sshll.u32 %s1305_s7, 4 }
  0x2b   : > { %s155_s9 = scalar_lea.hbm %s1845_s1, %s154_s12  ;;  %1878 = sst [smem:[#allocation62_spill]] %s1432_s13 }
  0x2c   : > { %s1421_s15 = scalar_lea.vmem %s1876_s2, %s594_s11  ;;  %s163_s11 = sshll.u32 %s155_s9, 4  ;;  %s164_s11 = int_to_ptr.hbm [resolvable:$true] %s163_s11 }
  0x2d   : > { %s755_s14 = sshra.s32 %s164_s11, 4  ;;  %s756_s14 = int_to_ptr.hbm [resolvable:$true] %s755_s14 }
  0x2e   : > { %s757_s23 = scalar_lea.hbm %s756_s14, 1  ;;  %p762_p5 = scmp.lt.s32.totalorder %s756_s14, %s1845_s1 }
  0x2f   : > { %p758_p1 = scmp.ne.s32.totalorder %s756_s14, %s757_s23  ;;  %p763_p6 = scmp.lt.s32.totalorder %s1440_s26, %s757_s23 }
  0x31   : > { %p759_p2 = pnand %p758_p1, %p667_p13  ;;  %p764_p7 = por %p763_p6, %p762_p5 }
  0x33   : > { %p760_p4 = pneg %p759_p2 }
  0x35   : > { %p765_p9 = pnand %p764_p7, %p760_p4 }
  0x37   : > { %768 = shalt.err (!%p765_p9)  }
  0x38   : > { %628 = dma.hbm_to_vmem [thread:$0]  (%p667_p13), %s164_s11, 16, %s166_s24, [#allocation3] }
  0x39   : > { %s170_s2 = scalar_lea.hbm %s1845_s1, %s600_s30  ;;  %s1306_s9 = smov [#allocation2 + $0x2]  }
  0x3a   : > { %s1451_s27 = sshll.u32 %s1306_s9, 4  ;;  %s179_s13 = sshll.u32 %s170_s2, 4  ;;  %s180_s13 = int_to_ptr.hbm [resolvable:$true] %s179_s13  ;;  %s198_s27 = int_to_ptr.vmem [resolvable:$true] %s1451_s27 }
  0x3b   : > { %s186_s23 = scalar_lea.hbm %s1845_s1, %s601_s4  ;;  %s783_s25 = sshra.s32 %s180_s13, 4  ;;  %s784_s25 = int_to_ptr.hbm [resolvable:$true] %s783_s25 }
  0x3c   : > { %s195_s14 = sshll.u32 %s186_s23, 4  ;;  %s785_s0 = scalar_lea.hbm %s784_s25, 1  ;;  %s196_s14 = int_to_ptr.hbm [resolvable:$true] %s195_s14 }
  0x3d   : > { %p786_p10 = scmp.ne.s32.totalorder %s784_s25, %s785_s0  ;;  %p790_p1 = scmp.lt.s32.totalorder %s784_s25, %s1845_s1 }
  0x3e   : > { %p791_p2 = scmp.lt.s32.totalorder %s1440_s26, %s785_s0 }
  0x3f   : > { %p787_p11 = pnand %p786_p10, %p667_p13 }
  0x40   : > { %p792_p4 = por %p791_p2, %p790_p1 }
  0x41   : > { %p788_p12 = pneg %p787_p11 }
  0x43   : > { %p793_p5 = pnand %p792_p4, %p788_p12 }
  0x45   : > { %796 = shalt.err (!%p793_p5)  }
  0x46   : > { %s1879_s30 = sld [smem:[#allocation62_spill]]  ;;  %s811_s7 = sshra.s32 %s196_s14, 4  ;;  %s812_s7 = int_to_ptr.hbm [resolvable:$true] %s811_s7 }
  0x47   : > { %s813_s19 = scalar_lea.hbm %s812_s7, 1  ;;  %p818_p10 = scmp.lt.s32.totalorder %s812_s7, %s1845_s1 }
  0x48   : > { %p814_p6 = scmp.ne.s32.totalorder %s812_s7, %s813_s19  ;;  %p819_p11 = scmp.lt.s32.totalorder %s1440_s26, %s813_s19 }
  0x4a   : > { %p815_p7 = pnand %p814_p6, %p667_p13  ;;  %p820_p12 = por %p819_p11, %p818_p10 }
  0x4c   : > { %s1880_s4 = int_to_ptr.vmem [resolvable:$true] %s1879_s30  ;;  %p816_p9 = pneg %p815_p7 }
  0x4d   : > { %629 = dma.hbm_to_vmem [thread:$0]  (%p667_p13), %s180_s13, 16, %s1880_s4, [#allocation3] }
  0x4e   : > { %p821_p1 = pnand %p820_p12, %p816_p9 }
  0x50   : > { %824 = shalt.err (!%p821_p1)  }
  0x51   : > { %630 = dma.hbm_to_vmem [thread:$0]  (%p667_p13), %s196_s14, 16, %s198_s27, [#allocation3] }
  0x52   : > { %s602_s13 = sld [smem:[#allocation5 + $0x3]]  ;;  %s1307_s2 = smov [#allocation2 + $0x3]  }
  0x53   : > { %s213_s9 = sshll.u32 %s1307_s2, 4  ;;  %s603_s12 = sld [smem:[#allocation5 + $0x4]]  ;;  %s214_s9 = int_to_ptr.vmem [resolvable:$true] %s213_s9 }
  0x54   : > { %s1308_s5 = smov [#allocation2 + $0x4]   ;;  %s1477_s24 = sld [smem:[#allocation5 + $0x5]] }
  0x55   : > { %s1475_s23 = sshll.u32 %s1308_s5, 4  ;;  %s1309_s11 = smov [#allocation2 + $0x5]  }
  0x56   : > { %1881 = sst [smem:[#allocation62_spill]] %s1475_s23  ;;  %s1480_s30 = sshll.u32 %s1309_s11, 4  ;;  %s246_s30 = int_to_ptr.vmem [resolvable:$true] %s1480_s30 }
  0x57   : > { %s1482_s4 = sld [smem:[#allocation5 + $0x6]] }
  0x58   : > { %s202_s7 = scalar_lea.hbm %s1845_s1, %s602_s13 }
  0x59   : > { %s211_s19 = sshll.u32 %s202_s7, 4  ;;  %s218_s2 = scalar_lea.hbm %s1845_s1, %s603_s12  ;;  %s212_s19 = int_to_ptr.hbm [resolvable:$true] %s211_s19 }
  0x5a   : > { %s227_s5 = sshll.u32 %s218_s2, 4  ;;  %s839_s23 = sshra.s32 %s212_s19, 4  ;;  %s840_s23 = int_to_ptr.hbm [resolvable:$true] %s839_s23  ;;  %s228_s5 = int_to_ptr.hbm [resolvable:$true] %s227_s5 }
  0x5b   : > { %s841_s21 = scalar_lea.hbm %s840_s23, 1  ;;  %p846_p6 = scmp.lt.s32.totalorder %s840_s23, %s1845_s1 }
  0x5c   : > { %p842_p2 = scmp.ne.s32.totalorder %s840_s23, %s841_s21  ;;  %p847_p7 = scmp.lt.s32.totalorder %s1440_s26, %s841_s21 }
  0x5e   : > { %p843_p4 = pnand %p842_p2, %p667_p13  ;;  %p848_p9 = por %p847_p7, %p846_p6 }
  0x60   : > { %p844_p5 = pneg %p843_p4 }
  0x62   : > { %p849_p10 = pnand %p848_p9, %p844_p5 }
  0x64   : > { %852 = shalt.err (!%p849_p10)  }
  0x65   : > { %631 = dma.hbm_to_vmem [thread:$0]  (%p667_p13), %s212_s19, 16, %s214_s9, [#allocation3] }
  0x66   : > { %s234_s27 = scalar_lea.hbm %s1845_s1, %s1477_s24  ;;  %s867_s14 = sshra.s32 %s228_s5, 4  ;;  %s868_s14 = int_to_ptr.hbm [resolvable:$true] %s867_s14 }
  0x67   : > { %s869_s7 = scalar_lea.hbm %s868_s14, 1  ;;  %p874_p2 = scmp.lt.s32.totalorder %s868_s14, %s1845_s1 }
  0x68   : > { %p870_p11 = scmp.ne.s32.totalorder %s868_s14, %s869_s7  ;;  %p875_p4 = scmp.lt.s32.totalorder %s1440_s26, %s869_s7 }
  0x6a   : > { %p871_p12 = pnand %p870_p11, %p667_p13  ;;  %p876_p5 = por %p875_p4, %p874_p2 }
  0x6c   : > { %p872_p1 = pneg %p871_p12 }
  0x6e   : > { %p877_p6 = pnand %p876_p5, %p872_p1 }
  0x70   : > { %880 = shalt.err (!%p877_p6)  }
  0x71   : > { %s1882_s9 = sld [smem:[#allocation62_spill]]  ;;  %s243_s24 = sshll.u32 %s234_s27, 4  ;;  %s244_s24 = int_to_ptr.hbm [resolvable:$true] %s243_s24 }
  0x72   : > { %s250_s25 = scalar_lea.hbm %s1845_s1, %s1482_s4  ;;  %s895_s11 = sshra.s32 %s244_s24, 4  ;;  %s896_s11 = int_to_ptr.hbm [resolvable:$true] %s895_s11 }
  0x73   : > { %s1517_s2 = sshll.u32 %s250_s25, 4  ;;  %s897_s13 = scalar_lea.hbm %s896_s11, 1  ;;  %s260_s2 = int_to_ptr.hbm [resolvable:$true] %s1517_s2 }
  0x74   : > { %p898_p7 = scmp.ne.s32.totalorder %s896_s11, %s897_s13  ;;  %p902_p11 = scmp.lt.s32.totalorder %s896_s11, %s1845_s1 }
  0x75   : > { %p903_p12 = scmp.lt.s32.totalorder %s1440_s26, %s897_s13 }
  0x76   : > { %p899_p9 = pnand %p898_p7, %p667_p13 }
  0x77   : > { %s1883_s23 = int_to_ptr.vmem [resolvable:$true] %s1882_s9  ;;  %p904_p1 = por %p903_p12, %p902_p11 }
  0x78   : > { %632 = dma.hbm_to_vmem [thread:$0]  (%p667_p13), %s228_s5, 16, %s1883_s23, [#allocation3] }
  0x79   : > { %p900_p10 = pneg %p899_p9 }
  0x7b   : > { %p905_p2 = pnand %p904_p1, %p900_p10 }
  0x7d   : > { %908 = shalt.err (!%p905_p2)  }
  0x7e   : > { %633 = dma.hbm_to_vmem [thread:$0]  (%p667_p13), %s244_s24, 16, %s246_s30, [#allocation3] }
  0x7f   : > { %s1310_s4 = smov [#allocation2 + $0x6]   ;;  %s606_s27 = sld [smem:[#allocation5 + $0x7]] }
  0x80   : > { %s261_s5 = sshll.u32 %s1310_s4, 4  ;;  %s923_s7 = sshra.s32 %s260_s2, 4  ;;  %s262_s5 = int_to_ptr.vmem [resolvable:$true] %s261_s5  ;;  %s924_s7 = int_to_ptr.hbm [resolvable:$true] %s923_s7 }
  0x81   : > { %s925_s21 = scalar_lea.hbm %s924_s7, 1  ;;  %p930_p7 = scmp.lt.s32.totalorder %s924_s7, %s1845_s1 }
  0x82   : > { %p926_p4 = scmp.ne.s32.totalorder %s924_s7, %s925_s21  ;;  %p931_p9 = scmp.lt.s32.totalorder %s1440_s26, %s925_s21 }
  0x84   : > { %p927_p5 = pnand %p926_p4, %p667_p13  ;;  %p932_p10 = por %p931_p9, %p930_p7 }
  0x86   : > { %p928_p6 = pneg %p927_p5 }
  0x88   : > { %p933_p11 = pnand %p932_p10, %p928_p6 }
  0x8a   : > { %936 = shalt.err (!%p933_p11)  }
  0x8b   : > { %634 = dma.hbm_to_vmem [thread:$0]  (%p667_p13), %s260_s2, 16, %s262_s5, [#allocation3] }
  0x8c   : > { %s1311_s30 = smov [#allocation2 + $0x7]   ;;  %p138_p12 = scmp.lt.s32.totalorder %s1414_s10, 0 }
  0x8d   : > { %s277_s23 = sshll.u32 %s1311_s30, 4  ;;  %s139_s24 = ssub.s32 0, %s1414_s10  ;;  %s278_s23 = int_to_ptr.vmem [resolvable:$true] %s277_s23 }
  0x8e   : > { %s596_s19 = smin.u32 %s139_s24, %s1414_s10  ;;  %s1856_s0 = sshll.u32 %s1414_s10, 3 }
  0x8f   : > { %s266_s13 = scalar_lea.hbm %s1845_s1, %s606_s27  ;;  %s141_s12 = sand.u32 1, %s596_s19  }
  0x90   : > { %s275_s14 = sshll.u32 %s266_s13, 4  ;;  %s142_s4 = ssub.s32 0, %s141_s12  ;;  %s276_s14 = int_to_ptr.hbm [resolvable:$true] %s275_s14 }
  0x91   : > { %s1547_s7 = sadd.s32 8, %s1856_s0  ;;  %s951_s2 = sshra.s32 %s276_s14, 4  ;;  %s952_s2 = int_to_ptr.hbm [resolvable:$true] %s951_s2 }
  0x92   : > { %s953_s5 = scalar_lea.hbm %s952_s2, 1  ;;  %p958_p5 = scmp.lt.s32.totalorder %s952_s2, %s1845_s1 }
  0x93   : > { %p954_p1 = scmp.ne.s32.totalorder %s952_s2, %s953_s5  ;;  %p959_p6 = scmp.lt.s32.totalorder %s1440_s26, %s953_s5 }
  0x95   : > { %p955_p2 = pnand %p954_p1, %p667_p13  ;;  %p960_p7 = por %p959_p6, %p958_p5 }
  0x97   : > { %p956_p4 = pneg %p955_p2 }
  0x99   : > { %p961_p9 = pnand %p960_p7, %p956_p4 }
  0x9b   : > { %964 = shalt.err (!%p961_p9)  }
  0x9c   : > { %635 = dma.hbm_to_vmem [thread:$0]  (%p667_p13), %s276_s14, 16, %s278_s23, [#allocation3] }
  0x9d   : > { %s1912_s4 = smov (!%p138_p12, %s142_s4), %s141_s12  ;;  %s306_s13 = sadd.s32 1, %s1547_s7 }
  0x9e   : > { %s637_s27 = scalar_select %p1425_p0, [#allocation5], [#allocation42] }
  0x9f   : > { %p598_p10 = scmp.lt.s32.totalorder %s1912_s4, 0  ;;  %s148_s9 = sadd.s32 2, %s1912_s4 }
  0xa0   : > { %s638_s30 = scalar_select %p1425_p0, %s1547_s7, 0 }
  0xa1   : > { %s1914_s9 = smov (!%p598_p10, %s148_s9), %s1912_s4  ;;  %s324_s21 = sadd.s32 2, %s1547_s7 }
  0xa2   : > { %s288_s24 = sld [smem:[%s637_s27 + %s638_s30]]  ;;  %s286_s19 = ssub.s32 1, %s1914_s9 }
  0xa3   : > { %s609_s25 = sshll.u32 %s286_s19, 3  ;;  %s1583_s27 = scalar_lea.sflag [#allocation3], %s286_s19 }
  0xa4   : > { %s1567_s11 = scalar_lea.vmem [#allocation2], %s609_s25 }
  0xa5   : > { %s302_s23 = sshll.u32 %s1567_s11, 4  ;;  %s518_s12 = scalar_lea.vmem %s1567_s11, 1 [#allocation2]  ;;  %s1575_s23 = int_to_ptr.vmem [resolvable:$true] %s302_s23 }
  0xa6   : > { %s1581_s6 = sshll.u32 %s518_s12, 4 }
  0xa7   : > { %1884 = sst [smem:[#allocation62_spill]] %s1581_s6 }
  0xa8   : > { %s289_s5 = scalar_lea.hbm %s1845_s1, %s288_s24 }
  0xa9   : > { %s1577_s4 = sshll.u32 %s289_s5, 4  ;;  %s301_s4 = int_to_ptr.hbm [resolvable:$true] %s1577_s4 }
  0xaa   : > { %s979_s30 = sshra.s32 %s301_s4, 4  ;;  %s980_s30 = int_to_ptr.hbm [resolvable:$true] %s979_s30 }
  0xab   : > { %s981_s25 = scalar_lea.hbm %s980_s30, 1  ;;  %p986_p1 = scmp.lt.s32.totalorder %s980_s30, %s1845_s1 }
  0xac   : > { %p982_p13 = scmp.ne.s32.totalorder %s980_s30, %s981_s25  ;;  %p987_p2 = scmp.lt.s32.totalorder %s1440_s26, %s981_s25 }
  0xae   : > { %p983_p11 = pnand %p982_p13, %p1425_p0  ;;  %p988_p4 = por %p987_p2, %p986_p1 }
  0xb0   : > { %p984_p12 = pneg %p983_p11 }
  0xb2   : > { %p989_p5 = pnand %p988_p4, %p984_p12 }
  0xb4   : > { %992 = shalt.err (!%p989_p5)  }
  0xb5   : > { %s993_s12 = sshra.s32 %s1575_s23, 4  ;;  %s1885_s2 = smov [#allocation2]   ;;  %s994_s12 = int_to_ptr.vmem [resolvable:$true] %s993_s12 }
  0xb6   : > { %s995_s19 = scalar_lea.vmem %s994_s12, 1  ;;  %s1595_s5 = scalar_lea.vmem %s1885_s2, 16 }
  0xb7   : > { %p996_p6 = scmp.ne.s32.totalorder %s994_s12, %s995_s19  ;;  %p1000_p10 = scmp.lt.s32.totalorder %s994_s12, [#allocation2] }
  0xb8   : > { %p1001_p13 = scmp.lt.s32.totalorder %s1595_s5, %s995_s19 }
  0xb9   : > { %p997_p7 = pnand %p996_p6, %p1425_p0 }
  0xba   : > { %p1002_p11 = por %p1001_p13, %p1000_p10 }
  0xbb   : > { %p998_p9 = pneg %p997_p7 }
  0xbd   : > { %p1003_p8 = pnand %p1002_p11, %p998_p9 }
  0xbf   : > { %1006 = shalt.err (!%p1003_p8)  }
  0xc0   : > { %639 = dma.hbm_to_vmem [thread:$0]  (%p1425_p0), %s301_s4, 16, %s1575_s23, %s1583_s27 }
  0xc1   : > { %s640_s30 = scalar_select %p1425_p0, [#allocation5], [#allocation43] }
  0xc2   : > { %s1916_s13 = smov (!%p1425_p0, %s306_s13), 0  ;;  %s1918_s21 = smov (!%p1425_p0, %s324_s21), 0 }
  0xc3   : > { %s643_s25 = scalar_select %p1425_p0, [#allocation5], [#allocation44] }
  0xc4   : > { %s307_s14 = sld [smem:[%s640_s30 + %s1916_s13]]  ;;  %s522_s24 = scalar_lea.vmem %s1567_s11, 2 [#allocation2] }
  0xc5   : > { %s342_s12 = sadd.s32 3, %s1547_s7  ;;  %s1617_s19 = sld [smem:[%s643_s25 + %s1918_s21]] }
  0xc6   : > { %s526_s2 = scalar_lea.vmem %s1567_s11, 3 [#allocation2]  ;;  %s1920_s12 = smov (!%p1425_p0, %s342_s12), 0 }
  0xc7   : > { %s646_s23 = scalar_select %p1425_p0, [#allocation5], [#allocation45] }
  0xc8   : > { %s1627_s13 = sshll.u32 %s522_s24, 4  ;;  %s1631_s29 = sshll.u32 %s526_s2, 4  ;;  %s339_s13 = int_to_ptr.vmem [resolvable:$true] %s1627_s13  ;;  %s357_s29 = int_to_ptr.vmem [resolvable:$true] %s1631_s29 }
  0xc9   : > { %s1629_s6 = sld [smem:[%s646_s23 + %s1920_s12]] }
  0xca   : > { %s308_s18 = scalar_lea.hbm %s1845_s1, %s307_s14 }
  0xcb   : > { %s318_s30 = sshll.u32 %s308_s18, 4  ;;  %s319_s30 = int_to_ptr.hbm [resolvable:$true] %s318_s30 }
  0xcc   : > { %s1007_s21 = sshra.s32 %s319_s30, 4  ;;  %s1008_s21 = int_to_ptr.hbm [resolvable:$true] %s1007_s21 }
  0xcd   : > { %s1009_s25 = scalar_lea.hbm %s1008_s21, 1  ;;  %p1014_p2 = scmp.lt.s32.totalorder %s1008_s21, %s1845_s1 }
  0xce   : > { %p1010_p8 = scmp.ne.s32.totalorder %s1008_s21, %s1009_s25  ;;  %p1015_p4 = scmp.lt.s32.totalorder %s1440_s26, %s1009_s25 }
  0xd0   : > { %p1011_p12 = pnand %p1010_p8, %p1425_p0  ;;  %p1016_p5 = por %p1015_p4, %p1014_p2 }
  0xd2   : > { %p1012_p1 = pneg %p1011_p12 }
  0xd4   : > { %p1017_p6 = pnand %p1016_p5, %p1012_p1 }
  0xd6   : > { %1020 = shalt.err (!%p1017_p6)  }
  0xd7   : > { %s1886_s18 = sld [smem:[#allocation62_spill]] }
  0xdd   : > { %s1887_s0 = int_to_ptr.vmem [resolvable:$true] %s1886_s18 }
  0xde   : > { %s1021_s14 = sshra.s32 %s1887_s0, 4  ;;  %s1022_s14 = int_to_ptr.vmem [resolvable:$true] %s1021_s14 }
  0xdf   : > { %s1023_s24 = scalar_lea.vmem %s1022_s14, 1  ;;  %p1028_p13 = scmp.lt.s32.totalorder %s1022_s14, [#allocation2] }
  0xe0   : > { %p1024_p7 = scmp.ne.s32.totalorder %s1022_s14, %s1023_s24  ;;  %p1029_p11 = scmp.lt.s32.totalorder %s1595_s5, %s1023_s24 }
  0xe2   : > { %p1025_p9 = pnand %p1024_p7, %p1425_p0  ;;  %p1030_p8 = por %p1029_p11, %p1028_p13 }
  0xe4   : > { %p1026_p10 = pneg %p1025_p9 }
  0xe6   : > { %p1031_p12 = pnand %p1030_p8, %p1026_p10 }
  0xe8   : > { %1034 = shalt.err (!%p1031_p12)  }
  0xe9   : > { %s1888_s16 = smov %s1887_s0  ;;  %s326_s2 = scalar_lea.hbm %s1845_s1, %s1617_s19 }
  0xea   : > { %642 = dma.hbm_to_vmem [thread:$0]  (%p1425_p0), %s319_s30, 16, %s1888_s16, %s1583_s27 }
  0xeb   : > { %s336_s23 = sshll.u32 %s326_s2, 4  ;;  %s530_s4 = scalar_lea.vmem %s1567_s11, 4 [#allocation2]  ;;  %s337_s23 = int_to_ptr.hbm [resolvable:$true] %s336_s23 }
  0xec   : > { %s1035_s21 = sshra.s32 %s337_s23, 4  ;;  %s1036_s21 = int_to_ptr.hbm [resolvable:$true] %s1035_s21 }
  0xed   : > { %s1037_s25 = scalar_lea.hbm %s1036_s21, 1  ;;  %p1042_p5 = scmp.lt.s32.totalorder %s1036_s21, %s1845_s1 }
  0xee   : > { %p1038_p1 = scmp.ne.s32.totalorder %s1036_s21, %s1037_s25  ;;  %p1043_p6 = scmp.lt.s32.totalorder %s1440_s26, %s1037_s25 }
  0xf0   : > { %p1039_p2 = pnand %p1038_p1, %p1425_p0  ;;  %p1044_p7 = por %p1043_p6, %p1042_p5 }
  0xf2   : > { %p1040_p4 = pneg %p1039_p2 }
  0xf4   : > { %p1045_p9 = pnand %p1044_p7, %p1040_p4 }
  0xf6   : > { %1048 = shalt.err (!%p1045_p9)  }
  0xf7   : > { %s1049_s19 = sshra.s32 %s339_s13, 4  ;;  %s1050_s19 = int_to_ptr.vmem [resolvable:$true] %s1049_s19 }
  0xf8   : > { %s1051_s30 = scalar_lea.vmem %s1050_s19, 1  ;;  %p1056_p8 = scmp.lt.s32.totalorder %s1050_s19, [#allocation2] }
  0xf9   : > { %p1052_p10 = scmp.ne.s32.totalorder %s1050_s19, %s1051_s30  ;;  %p1057_p12 = scmp.lt.s32.totalorder %s1595_s5, %s1051_s30 }
  0xfb   : > { %p1053_p13 = pnand %p1052_p10, %p1425_p0  ;;  %p1058_p1 = por %p1057_p12, %p1056_p8 }
  0xfd   : > { %p1054_p11 = pneg %p1053_p13 }
  0xff   : > { %p1059_p2 = pnand %p1058_p1, %p1054_p11 }
 0x101   : > { %1062 = shalt.err (!%p1059_p2)  }
 0x102   : > { %645 = dma.hbm_to_vmem [thread:$0]  (%p1425_p0), %s337_s23, 16, %s339_s13, %s1583_s27 }
 0x103   : > { %s344_s16 = scalar_lea.hbm %s1845_s1, %s1629_s6  ;;  %s360_s22 = sadd.s32 4, %s1547_s7 }
 0x104   : > { %s354_s12 = sshll.u32 %s344_s16, 4  ;;  %s1673_s2 = sshll.u32 %s530_s4, 4  ;;  %s355_s12 = int_to_ptr.hbm [resolvable:$true] %s354_s12  ;;  %s375_s2 = int_to_ptr.vmem [resolvable:$true] %s1673_s2 }
 0x105   : > { %s378_s21 = sadd.s32 5, %s1547_s7  ;;  %s1063_s25 = sshra.s32 %s355_s12, 4  ;;  %s1064_s25 = int_to_ptr.hbm [resolvable:$true] %s1063_s25 }
 0x106   : > { %s1065_s18 = scalar_lea.hbm %s1064_s25, 1  ;;  %p1070_p7 = scmp.lt.s32.totalorder %s1064_s25, %s1845_s1 }
 0x107   : > { %p1066_p4 = scmp.ne.s32.totalorder %s1064_s25, %s1065_s18  ;;  %p1071_p9 = scmp.lt.s32.totalorder %s1440_s26, %s1065_s18 }
 0x109   : > { %p1067_p5 = pnand %p1066_p4, %p1425_p0  ;;  %p1072_p10 = por %p1071_p9, %p1070_p7 }
 0x10b   : > { %p1068_p6 = pneg %p1067_p5 }
 0x10d   : > { %p1073_p13 = pnand %p1072_p10, %p1068_p6 }
 0x10f   : > { %1076 = shalt.err (!%p1073_p13)  }
 0x110   : > { %s1077_s6 = sshra.s32 %s357_s29, 4  ;;  %s1078_s6 = int_to_ptr.vmem [resolvable:$true] %s1077_s6 }
 0x111   : > { %s1079_s13 = scalar_lea.vmem %s1078_s6, 1  ;;  %p1084_p1 = scmp.lt.s32.totalorder %s1078_s6, [#allocation2] }
 0x112   : > { %p1080_p11 = scmp.ne.s32.totalorder %s1078_s6, %s1079_s13  ;;  %p1085_p2 = scmp.lt.s32.totalorder %s1595_s5, %s1079_s13 }
 0x114   : > { %p1081_p8 = pnand %p1080_p11, %p1425_p0  ;;  %p1086_p4 = por %p1085_p2, %p1084_p1 }
 0x116   : > { %p1082_p12 = pneg %p1081_p8 }
 0x118   : > { %p1087_p5 = pnand %p1086_p4, %p1082_p12 }
 0x11a   : > { %1090 = shalt.err (!%p1087_p5)  }
 0x11b   : > { %648 = dma.hbm_to_vmem [thread:$0]  (%p1425_p0), %s355_s12, 16, %s357_s29, %s1583_s27 }
 0x11c   : > { %s649_s23 = scalar_select %p1425_p0, [#allocation5], [#allocation46] }
 0x11d   : > { %s1922_s22 = smov (!%p1425_p0, %s360_s22), 0  ;;  %s1924_s21 = smov (!%p1425_p0, %s378_s21), 0 }
 0x11e   : > { %s652_s4 = scalar_select %p1425_p0, [#allocation5], [#allocation47] }
 0x11f   : > { %s361_s30 = sld [smem:[%s649_s23 + %s1922_s22]]  ;;  %s396_s14 = sadd.s32 6, %s1547_s7 }
 0x120   : > { %s1704_s24 = sld [smem:[%s652_s4 + %s1924_s21]]  ;;  %s534_s16 = scalar_lea.vmem %s1567_s11, 5 [#allocation2] }
 0x121   : > { %s655_s29 = scalar_select %p1425_p0, [#allocation5], [#allocation48] }
 0x122   : > { %s1926_s14 = smov (!%p1425_p0, %s396_s14), 0  ;;  %s1714_s0 = sshll.u32 %s534_s16, 4  ;;  %s393_s0 = int_to_ptr.vmem [resolvable:$true] %s1714_s0 }
 0x123   : > { %s1716_s19 = sld [smem:[%s655_s29 + %s1926_s14]]  ;;  %s538_s6 = scalar_lea.vmem %s1567_s11, 6 [#allocation2] }
 0x125   : > { %s362_s18 = scalar_lea.hbm %s1845_s1, %s361_s30 }
 0x126   : > { %s372_s22 = sshll.u32 %s362_s18, 4  ;;  %s373_s22 = int_to_ptr.hbm [resolvable:$true] %s372_s22 }
 0x127   : > { %s1091_s13 = sshra.s32 %s373_s22, 4  ;;  %s1092_s13 = int_to_ptr.hbm [resolvable:$true] %s1091_s13 }
 0x128   : > { %s1093_s21 = scalar_lea.hbm %s1092_s13, 1  ;;  %p1098_p10 = scmp.lt.s32.totalorder %s1092_s13, %s1845_s1 }
 0x129   : > { %p1094_p6 = scmp.ne.s32.totalorder %s1092_s13, %s1093_s21  ;;  %p1099_p13 = scmp.lt.s32.totalorder %s1440_s26, %s1093_s21 }
 0x12b   : > { %p1095_p7 = pnand %p1094_p6, %p1425_p0  ;;  %p1100_p11 = por %p1099_p13, %p1098_p10 }
 0x12d   : > { %p1096_p9 = pneg %p1095_p7 }
 0x12f   : > { %p1101_p8 = pnand %p1100_p11, %p1096_p9 }
 0x131   : > { %1104 = shalt.err (!%p1101_p8)  }
 0x132   : > { %s1105_s30 = sshra.s32 %s375_s2, 4  ;;  %s1106_s30 = int_to_ptr.vmem [resolvable:$true] %s1105_s30 }
 0x133   : > { %s1107_s14 = scalar_lea.vmem %s1106_s30, 1  ;;  %p1112_p4 = scmp.lt.s32.totalorder %s1106_s30, [#allocation2] }
 0x134   : > { %p1108_p12 = scmp.ne.s32.totalorder %s1106_s30, %s1107_s14  ;;  %p1113_p5 = scmp.lt.s32.totalorder %s1595_s5, %s1107_s14 }
 0x136   : > { %p1109_p1 = pnand %p1108_p12, %p1425_p0  ;;  %p1114_p6 = por %p1113_p5, %p1112_p4 }
 0x138   : > { %p1110_p2 = pneg %p1109_p1 }
 0x13a   : > { %p1115_p7 = pnand %p1114_p6, %p1110_p2 }
 0x13c   : > { %1118 = shalt.err (!%p1115_p7)  }
 0x13d   : > { %651 = dma.hbm_to_vmem [thread:$0]  (%p1425_p0), %s373_s22, 16, %s375_s2, %s1583_s27 }
 0x13e   : > { %s380_s12 = scalar_lea.hbm %s1845_s1, %s1704_s24  ;;  %s1740_s18 = sshll.u32 %s538_s6, 4  ;;  %s411_s18 = int_to_ptr.vmem [resolvable:$true] %s1740_s18 }
 0x13f   : > { %s390_s25 = sshll.u32 %s380_s12, 4  ;;  %s391_s25 = int_to_ptr.hbm [resolvable:$true] %s390_s25 }
 0x140   : > { %s1119_s13 = sshra.s32 %s391_s25, 4  ;;  %s1120_s13 = int_to_ptr.hbm [resolvable:$true] %s1119_s13 }
 0x141   : > { %s1121_s21 = scalar_lea.hbm %s1120_s13, 1  ;;  %p1126_p11 = scmp.lt.s32.totalorder %s1120_s13, %s1845_s1 }
 0x142   : > { %p1122_p9 = scmp.ne.s32.totalorder %s1120_s13, %s1121_s21  ;;  %p1127_p8 = scmp.lt.s32.totalorder %s1440_s26, %s1121_s21 }
 0x144   : > { %p1123_p10 = pnand %p1122_p9, %p1425_p0  ;;  %p1128_p12 = por %p1127_p8, %p1126_p11 }
 0x146   : > { %p1124_p13 = pneg %p1123_p10 }
 0x148   : > { %p1129_p1 = pnand %p1128_p12, %p1124_p13 }
 0x14a   : > { %1132 = shalt.err (!%p1129_p1)  }
 0x14b   : > { %s1133_s2 = sshra.s32 %s393_s0, 4  ;;  %s1134_s2 = int_to_ptr.vmem [resolvable:$true] %s1133_s2 }
 0x14c   : > { %s1135_s24 = scalar_lea.vmem %s1134_s2, 1  ;;  %p1140_p6 = scmp.lt.s32.totalorder %s1134_s2, [#allocation2] }
 0x14d   : > { %p1136_p2 = scmp.ne.s32.totalorder %s1134_s2, %s1135_s24  ;;  %p1141_p7 = scmp.lt.s32.totalorder %s1595_s5, %s1135_s24 }
 0x14f   : > { %p1137_p4 = pnand %p1136_p2, %p1425_p0  ;;  %p1142_p9 = por %p1141_p7, %p1140_p6 }
 0x151   : > { %p1138_p5 = pneg %p1137_p4 }
 0x153   : > { %p1143_p10 = pnand %p1142_p9, %p1138_p5 }
 0x155   : > { %1146 = shalt.err (!%p1143_p10)  }
 0x156   : > { %654 = dma.hbm_to_vmem [thread:$0]  (%p1425_p0), %s391_s25, 16, %s393_s0, %s1583_s27 }
 0x157   : > { %s398_s30 = scalar_lea.hbm %s1845_s1, %s1716_s19  ;;  %s414_s16 = sadd.s32 7, %s1547_s7 }
 0x158   : > { %s408_s14 = sshll.u32 %s398_s30, 4  ;;  %s409_s14 = int_to_ptr.hbm [resolvable:$true] %s408_s14 }
 0x159   : > { %s1147_s29 = sshra.s32 %s409_s14, 4  ;;  %s1148_s29 = int_to_ptr.hbm [resolvable:$true] %s1147_s29 }
 0x15a   : > { %s1149_s12 = scalar_lea.hbm %s1148_s29, 1  ;;  %p1154_p12 = scmp.lt.s32.totalorder %s1148_s29, %s1845_s1 }
 0x15b   : > { %p1150_p13 = scmp.ne.s32.totalorder %s1148_s29, %s1149_s12  ;;  %p1155_p1 = scmp.lt.s32.totalorder %s1440_s26, %s1149_s12 }
 0x15d   : > { %p1151_p11 = pnand %p1150_p13, %p1425_p0  ;;  %p1156_p2 = por %p1155_p1, %p1154_p12 }
 0x15f   : > { %p1152_p8 = pneg %p1151_p11 }
 0x161   : > { %p1157_p4 = pnand %p1156_p2, %p1152_p8 }
 0x163   : > { %1160 = shalt.err (!%p1157_p4)  }
 0x164   : > { %s1161_s0 = sshra.s32 %s411_s18, 4  ;;  %s1162_s0 = int_to_ptr.vmem [resolvable:$true] %s1161_s0 }
 0x165   : > { %s1163_s7 = scalar_lea.vmem %s1162_s0, 1  ;;  %p1168_p9 = scmp.lt.s32.totalorder %s1162_s0, [#allocation2] }
 0x166   : > { %p1164_p5 = scmp.ne.s32.totalorder %s1162_s0, %s1163_s7  ;;  %p1169_p10 = scmp.lt.s32.totalorder %s1595_s5, %s1163_s7 }
 0x168   : > { %p1165_p6 = pnand %p1164_p5, %p1425_p0  ;;  %p1170_p13 = por %p1169_p10, %p1168_p9 }
 0x16a   : > { %p1166_p7 = pneg %p1165_p6 }
 0x16c   : > { %p1171_p11 = pnand %p1170_p13, %p1166_p7 }
 0x16e   : > { %1174 = shalt.err (!%p1171_p11)  }
 0x16f   : > { %657 = dma.hbm_to_vmem [thread:$0]  (%p1425_p0), %s409_s14, 16, %s411_s18, %s1583_s27 }
 0x170   : > { %s658_s19 = scalar_select %p1425_p0, [#allocation5], [#allocation49] }
 0x171   : > { %s1928_s16 = smov (!%p1425_p0, %s414_s16), 0  ;;  %s542_s23 = scalar_lea.vmem %s1567_s11, 7 [#allocation2] }
 0x172   : > { %s415_s25 = sld [smem:[%s658_s19 + %s1928_s16]]  ;;  %s1777_s4 = sshll.u32 %s542_s23, 4  ;;  %s429_s4 = int_to_ptr.vmem [resolvable:$true] %s1777_s4 }
 0x178   : > { %s416_s22 = scalar_lea.hbm %s1845_s1, %s415_s25 }
 0x179   : > { %s426_s6 = sshll.u32 %s416_s22, 4  ;;  %s427_s6 = int_to_ptr.hbm [resolvable:$true] %s426_s6 }
 0x17a   : > { %s1175_s30 = sshra.s32 %s427_s6, 4  ;;  %s1176_s30 = int_to_ptr.hbm [resolvable:$true] %s1175_s30 }
 0x17b   : > { %s1177_s18 = scalar_lea.hbm %s1176_s30, 1  ;;  %p1182_p2 = scmp.lt.s32.totalorder %s1176_s30, %s1845_s1 }
 0x17c   : > { %p1178_p8 = scmp.ne.s32.totalorder %s1176_s30, %s1177_s18  ;;  %p1183_p4 = scmp.lt.s32.totalorder %s1440_s26, %s1177_s18 }
 0x17e   : > { %p1179_p12 = pnand %p1178_p8, %p1425_p0  ;;  %p1184_p5 = por %p1183_p4, %p1182_p2 }
 0x180   : > { %p1180_p1 = pneg %p1179_p12 }
 0x182   : > { %p1185_p6 = pnand %p1184_p5, %p1180_p1 }
 0x184   : > { %1188 = shalt.err (!%p1185_p6)  }
 0x185   : > { %s1189_s11 = sshra.s32 %s429_s4, 4  ;;  %s1190_s11 = int_to_ptr.vmem [resolvable:$true] %s1189_s11 }
 0x186   : > { %s1191_s29 = scalar_lea.vmem %s1190_s11, 1  ;;  %p1196_p13 = scmp.lt.s32.totalorder %s1190_s11, [#allocation2] }
 0x187   : > { %p1192_p7 = scmp.ne.s32.totalorder %s1190_s11, %s1191_s29  ;;  %p1197_p11 = scmp.lt.s32.totalorder %s1595_s5, %s1191_s29 }
 0x189   : > { %p1193_p9 = pnand %p1192_p7, %p1425_p0  ;;  %p1198_p8 = por %p1197_p11, %p1196_p13 }
 0x18b   : > { %p1194_p10 = pneg %p1193_p9 }
 0x18d   : > { %p1199_p12 = pnand %p1198_p8, %p1194_p10 }
 0x18f   : > { %1202 = shalt.err (!%p1199_p12)  }
 0x190   : > { %660 = dma.hbm_to_vmem [thread:$0]  (%p1425_p0), %s427_s6, 16, %s429_s4, %s1583_s27 }
 0x191   : > { %s131_s26 = scalar_lea.vmem [#allocation6], %s1410_s8  ;;  %s432_s12 = scalar_lea.sflag [#allocation3], %s1914_s9 }
 0x192   : > { %1265 = dma.done.wait %s432_s12, 128 }
 0x193   : > { %1266 = vsyncadd %s432_s12, 4294967168  ;;  %s617_s13 = sshll.u32 %s1914_s9, 3  ;;  %s1889_s21 = sshll.u32 %s1414_s10, 3  ;;  %v439_v1 = vld [vmem:[%s1421_s15] sm:$0xff] }
 0x194   : > { %s455_s7 = scalar_lea.hbm %s1847_s3, %s1889_s21  ;;  %s457_s20 = sshll.u32 %s131_s26, 4  ;;  %s458_s20 = int_to_ptr.vmem [resolvable:$true] %s457_s20 }
 0x195   : > { %s459_s19 = sshll.u32 %s455_s7, 4  ;;  %s437_s25 = scalar_lea.vmem [#allocation2], %s617_s13  ;;  %s460_s19 = int_to_ptr.hbm [resolvable:$true] %s459_s19 }
 0x196   : > { %v438_v0 = vld [vmem:[%s437_s25] sm:$0xff]  ;;  %s1890_s8 = sand.u32 1, %s1277_s17   ;;  %s1217_s23 = sshra.s32 %s460_s19, 4  ;;  %s1218_s23 = int_to_ptr.hbm [resolvable:$true] %s1217_s23 }
 0x197   : > { %v440_v2 = vadd.f32 %v439_v1, %v438_v0  ;;  %s443_s27 = scalar_lea.sflag [#allocation7], %s1890_s8  ;;  %s1219_s9 = scalar_lea.hbm %s1218_s23, 8 }
 0x198   : > { %p1220_p0 = scmp.ne.s32.totalorder %s1218_s23, %s1219_s9  ;;  %s1223_s2 = scalar_lea.hbm %s1847_s3, 32 }
 0x199   : > { %441 = vst [vmem:[%s131_s26] sm:$0xff] %v440_v2  ;;  %p1224_p4 = scmp.lt.s32.totalorder %s1218_s23, %s1847_s3  ;;  %p1225_p5 = scmp.lt.s32.totalorder %s1223_s2, %s1219_s9 }
 0x19a   : > { %p1221_p1 = pnand %p1220_p0, %p1386_p3 }
 0x19b   : > { %p1226_p6 = por %p1225_p5, %p1224_p4 }
 0x19c   : > { %p1222_p2 = pneg %p1221_p1 }
 0x19e   : > { %p1227_p7 = pnand %p1226_p6, %p1222_p2 }
 0x1a0   : > { %1230 = shalt.err (!%p1227_p7)
}
 0x1a1   : > { %661 = dma.vmem_to_hbm [thread:$0]  (%p1386_p3), %s458_s20, 128, %s460_s19, %s443_s27  }
 0x1a2 PF: > { %s1891_s15 = sld [smem:[#allocation57_spill]] }
 0x1a3   : > { %s1892_s6 = sld [smem:[#allocation53_spill]] }
 0x1a4   : > { %s1893_s30 = sld [smem:[#allocation60_spill]] }
 0x1a8   : > { %p669_p9 = scmp.ge.s32.totalorder %s1891_s15, 2 }
 0x1a9   : > { %s471_s18 = sand.u32 1, %s1892_s6  }
 0x1aa   : > { %p1894_p10 = scmp.ne.s32.totalorder %s1893_s30, 0  ;;  %s472_s14 = scalar_lea.sflag [#allocation7], %s471_s18 }
 0x1ac   : > { %p664_p13 = pnand %p669_p9, %p1894_p10 }
 0x1ae   : > { %p665_p11 = pneg %p664_p13 }
 0x1b0   : > { %1268 = dma.done.wait (%p665_p11), %s472_s14, 128  }
 0x1b1   : > { %1270 = vsyncadd (%p665_p11), %s472_s14, 4294967168  ;;  %s24_s22 = sadd.s32 1, %s1891_s15   ;;  %s1895_s11 = sld [smem:[#allocation54_spill]] }
 0x1b2   : > { %p21_p8 = scmp.ge.s32.totalorder %s24_s22, 6   ;;  %s1896_s18 = sld [smem:[#allocation61_spill]] }
 0x1b3   : > { %s1897_s19 = sld [smem:[#allocation55_spill]]  ;;  %s1901_s16 = smov %s1277_s17 }
 0x1b4   : > { %s1898_s20 = sld [smem:[#allocation56_spill]]  ;;  %23 = sbr.rel (!%p21_p8) target bundleno = 11 (0xb), region = 166 }
 0x1b5   : > { %s1899_s21 = sld [smem:[#allocation58_spill]] }
 0x1b6   : > { %s1900_s0 = sld [smem:[#allocation59_spill]] }
 0x1b7   : > { %s1902_s17 = smov %s1895_s11 }
 0x1b9   :  { %478 = vsyncpa [#allocation7], 1 }
 0x1ba   :  { %480 = vsyncpa [#allocation7 + $0x1], 1 }
 0x1bb   :  { %481 = vsyncmov [#allocation3] }
 0x1be   :  { %s482_s28 = vpop.sfrf %481 }
 0x1bf   :  { %p623_p3 = scmp.ne.s32.totalorder %s482_s28, 0 }
 0x1c1   :  { %486 = shalt.err (%p623_p3)  }
 0x1c2   :  { %488 = vsyncmov [#allocation3 + $0x1] }
 0x1c5   :  { %s489_s29 = vpop.sfrf %488 }
 0x1c6   :  { %p624_p12 = scmp.ne.s32.totalorder %s489_s29, 0 }
 0x1c8   :  { %493 = shalt.err (%p624_p12)  }

</bundles_post_ra>
